<compile_context>
chip_gen: v7x
topology: tpu7x:2x2x1
jax: 0.10.0
libtpu: 0.0.40
codegen_flags: <defaults>
</compile_context>

<pallas_src>
import jax
import jax.numpy as jnp
from jax.experimental import pallas as pl
from jax.experimental.pallas import tpu as pltpu

LEAKY_SLOPE = 0.01  # nn.LeakyReLU default negative_slope


def _round_up(x, m):
    return ((x + m - 1) // m) * m


def _leaky_relu(x):
    # max(x, a*x) == LeakyReLU(x) for 0 < a < 1; cheaper than compare+select.
    return jnp.maximum(x, LEAKY_SLOPE * x)


def _ex_kernel(omv_ref, x_ref, w1_ref, b1_ref, w2t_ref, b2t_ref, w3t_ref,
               b3t_ref, o_ref):
    # x_ref: (CIN, TS) f32 tile -- channels on sublanes, pixels on lanes.
    x = x_ref[...]
    cin = x.shape[0]
    cout = o_ref.shape[0]

    # ---- encoder (1x1 conv, K = cin <= 3): VPU broadcast multiply-adds ----
    # Keeps the shallow K=3 contraction off the MXU entirely.  w1/b1 are
    # zero-padded to 128 rows so the result is transpose-friendly.
    w1 = w1_ref[...]                              # (NFP, CIN) f32
    h = b1_ref[...] + w1[:, 0:1] * x[0:1, :]      # (NFP, TS) f32
    for i in range(1, cin):                       # cin is static & tiny
        h = h + w1[:, i:i + 1] * x[i:i + 1, :]
    h = _leaky_relu(h)                            # rows >= base_nf stay 0

    # ---- enter the pixel-major domain: (NFP, TS) -> (TS, NFP) via XLU -----
    h_t = jnp.transpose(h)                        # (TS, NFP) f32

    # ---- mid conv: weight-stationary MXU, bf16 operands, f32 accumulate ---
    h2 = jnp.dot(h_t.astype(jnp.bfloat16), w2t_ref[...],
                 preferred_element_type=jnp.float32) + b2t_ref[...]
    h2 = _leaky_relu(h2)                          # (TS, NFP) f32

    # ---- decoder (val already folded into w3t/b3t), weight-stationary -----
    y_t = jnp.dot(h2.astype(jnp.bfloat16), w3t_ref[...],
                  preferred_element_type=jnp.float32) + b3t_ref[...]

    # ---- leave the pixel-major domain and blend (f32 residual path) -------
    y = jnp.transpose(y_t)                        # (NFP, TS) f32; rows<cout real
    o_ref[...] = omv_ref[0, 0] * x + y[0:cout, :]


def _prep_params(params, val, nfp):
    """Pad / transpose / pre-scale weights on the host (tiny arrays)."""
    w1, b1 = params["w1"], params["b1"]           # (nf, cin), (nf, 1)
    w2, b2 = params["w2"], params["b2"]           # (nf, nf),  (nf, 1)
    w3, b3 = params["w3"], params["b3"]           # (cout, nf), (cout, 1)
    nf, _cin = w1.shape
    cout = w3.shape[0]
    v = jnp.asarray(val, jnp.float32)

    # encoder stays f32 on the VPU, channel-major, zero-padded to nfp rows
    w1p = jnp.zeros((nfp, w1.shape[1]), jnp.float32).at[:nf].set(w1)
    b1p = jnp.zeros((nfp, 1), jnp.float32).at[:nf].set(b1)
    # mid conv: transposed (contraction axis first), zero-padded, bf16 MXU
    w2t = (jnp.zeros((nfp, nfp), jnp.float32)
           .at[:nf, :nf].set(w2.T).astype(jnp.bfloat16))
    b2t = jnp.zeros((1, nfp), jnp.float32).at[0, :nf].set(b2[:, 0])
    # decoder: transposed, `val` folded in, zero-padded, bf16 MXU (bias f32)
    w3t = (jnp.zeros((nfp, nfp), jnp.float32)
           .at[:nf, :cout].set((v * w3).T).astype(jnp.bfloat16))
    b3t = jnp.zeros((1, nfp), jnp.float32).at[0, :cout].set(v * b3[:, 0])
    # the only scalar the kernel still needs: (1 - val), via SMEM
    omv = (1.0 - v).reshape(1, 1)
    return w1p, b1p, w2t, b2t, w3t, b3t, omv


def ex_corrector_pallas(img, val, params, *, tile_p=8192):
    """img: (N, C, H, W) float32, val: scalar, params: dict of weights.

    Weights are in PyTorch conv orientation: w1 (nf, in_nc), w2 (nf, nf),
    w3 (out_nc, nf); biases (channels, 1).
    """
    n, c, h, w = img.shape
    nf, cin = params["w1"].shape
    cout = params["w3"].shape[0]
    assert c == cin and cout == cin   # residual blend requires out_nc == in_nc
    nfp = max(128, _round_up(nf, 128))  # pad channel domain to 128 lanes

    hw = h * w
    # NCHW -> (N, C, H*W): pure reshape, no data movement.
    x3d = img.reshape(n, c, hw).astype(jnp.float32)

    # Pixel tile: lane-aligned (128), as big as possible but never bigger than
    # the image, then shrunk (>=2048 lanes) until the grid has enough parallel
    # steps to feed both v7x TensorCores / the DMA pipeline.
    hw128 = _round_up(hw, 128)
    ts = min(_round_up(tile_p, 128), hw128)
    min_ts = min(2048, hw128)
    while n * pl.cdiv(hw128, ts) < 8 and ts > min_ts:
        ts = max(min_ts, _round_up(ts // 2, 128))
    p_pad = pl.cdiv(hw, ts) * ts
    if p_pad != hw:
        x3d = jnp.pad(x3d, ((0, 0), (0, 0), (0, p_pad - hw)))

    w1p, b1p, w2t, b2t, w3t, b3t, omv = _prep_params(params, val, nfp)

    grid = (n, p_pad // ts)

    out3d = pl.pallas_call(
        _ex_kernel,
        out_shape=jax.ShapeDtypeStruct((n, cout, p_pad), jnp.float32),
        grid_spec=pltpu.PrefetchScalarGridSpec(
            num_scalar_prefetch=0,
            grid=grid,
            in_specs=[
                # (1 - val) scalar lives in SMEM
                pl.BlockSpec(memory_space=pltpu.MemorySpace.SMEM),
                # input pixel tile: batch squeezed, (CIN, TS) lane-dense
                pl.BlockSpec((None, cin, ts), lambda b, i: (b, 0, i)),
                # weights / biases: full (tiny) arrays, same block every step
                pl.BlockSpec((nfp, cin), lambda b, i: (0, 0)),
                pl.BlockSpec((nfp, 1), lambda b, i: (0, 0)),
                pl.BlockSpec((nfp, nfp), lambda b, i: (0, 0)),
                pl.BlockSpec((1, nfp), lambda b, i: (0, 0)),
                pl.BlockSpec((nfp, nfp), lambda b, i: (0, 0)),
                pl.BlockSpec((1, nfp), lambda b, i: (0, 0)),
            ],
            out_specs=pl.BlockSpec((None, cout, ts), lambda b, i: (b, 0, i)),
        ),
        compiler_params=pltpu.CompilerParams(
            dimension_semantics=("parallel", "parallel"),
            # 48 MiB: above the default scoped limit everywhere, below v7x's
            # 64 MiB physical VMEM (v5e/v6e have 128 MiB -> plenty of room).
            vmem_limit_bytes=48 * 1024 * 1024),
    )(omv, x3d, w1p, b1p, w2t, b2t, w3t, b3t)

    # (N, C, P_pad) -> NCHW (drop pixel padding; pure reshape).
    return out3d[:, :, :hw].reshape(n, cout, h, w)


def init_params(key, in_nc=3, out_nc=3, base_nf=64):
    """Deterministic synthetic weights matching Conv2d(.,.,1,1) shapes."""
    k1, k2, k3, k4, k5, k6 = jax.random.split(key, 6)
    s1 = 1.0 / (in_nc ** 0.5)
    s2 = 1.0 / (base_nf ** 0.5)
    return {
        "w1": jax.random.uniform(k1, (base_nf, in_nc), jnp.float32, -s1, s1),
        "b1": jax.random.uniform(k2, (base_nf, 1), jnp.float32, -s1, s1),
        "w2": jax.random.uniform(k3, (base_nf, base_nf), jnp.float32, -s2, s2),
        "b2": jax.random.uniform(k4, (base_nf, 1), jnp.float32, -s2, s2),
        "w3": jax.random.uniform(k5, (out_nc, base_nf), jnp.float32, -s2, s2),
        "b3": jax.random.uniform(k6, (out_nc, 1), jnp.float32, -s2, s2),
    }


def ex_corrector_ref(img, val, params):
    """Plain-JAX f32 reference of the PyTorch forward (sanity check)."""
    n, c, hh, ww = img.shape
    x = img.reshape(n, c, hh * ww).astype(jnp.float32)
    h = jnp.einsum("oi,bip->bop", params["w1"], x) + params["b1"][None]
    h = jnp.where(h > 0, h, LEAKY_SLOPE * h)
    h = jnp.einsum("oi,bip->bop", params["w2"], h) + params["b2"][None]
    h = jnp.where(h > 0, h, LEAKY_SLOPE * h)
    y = jnp.einsum("oi,bip->bop", params["w3"], h) + params["b3"][None]
    out = val * y + (1.0 - val) * x
    return out.reshape(n, c, hh, ww)


if __name__ == "__main__":
    key = jax.random.PRNGKey(0)
    k_img, k_params = jax.random.split(key)

    N, C, H, W = 2, 3, 16, 16          # in_nc = out_nc = 3, base_nf = 64
    img = jax.random.uniform(k_img, (N, C, H, W), jnp.float32)
    val = 0.7                           # exposure value scalar

    params = init_params(k_params, in_nc=C, out_nc=C, base_nf=64)

    out = jax.block_until_ready(ex_corrector_pallas(img, val, params))

    ref = ex_corrector_ref(img, val, params)
    assert out.shape == (N, C, H, W)
    # bf16 MXU operands -> compare at relaxed tolerance (residual path is f32).
    err = float(jnp.max(jnp.abs(out - ref)))
    assert jnp.allclose(out, ref, atol=5e-2, rtol=5e-2), err

    print("KERNEL_OK")
</pallas_src>

<mosaic_0001>
module attributes {stable_mosaic.version = 11 : i64} {
  func.func @_ex_kernel(%arg0: i32, %arg1: i32, %arg2: memref<1x1xf32, #tpu.memory_space<smem>>, %arg3: memref<1x3x256xf32, #tpu.memory_space<vmem>>, %arg4: memref<128x3xf32, #tpu.memory_space<vmem>>, %arg5: memref<128x1xf32, #tpu.memory_space<vmem>>, %arg6: memref<128x128xbf16, #tpu.memory_space<vmem>>, %arg7: memref<1x128xf32, #tpu.memory_space<vmem>>, %arg8: memref<128x128xbf16, #tpu.memory_space<vmem>>, %arg9: memref<1x128xf32, #tpu.memory_space<vmem>>, %arg10: memref<1x3x256xf32, #tpu.memory_space<vmem>>) attributes {dimension_semantics = [#tpu.dimension_semantics<parallel>, #tpu.dimension_semantics<parallel>], iteration_bounds = array<i64: 2, 1>, scalar_prefetch = 0 : i64, scratch_operands = 0 : i64, tpu.core_type = #tpu.core_type<tc>, window_params = [{transform_indices = @transform_0, window_bounds = array<i64: 1, 1>}, {transform_indices = @transform_1, window_bounds = array<i64: 1, 3, 256>}, {pipeline_mode = #tpu.pipeline_mode<synchronous>, transform_indices = @transform_2, window_bounds = array<i64: 128, 3>}, {pipeline_mode = #tpu.pipeline_mode<synchronous>, transform_indices = @transform_3, window_bounds = array<i64: 128, 1>}, {pipeline_mode = #tpu.pipeline_mode<synchronous>, transform_indices = @transform_4, window_bounds = array<i64: 128, 128>}, {pipeline_mode = #tpu.pipeline_mode<synchronous>, transform_indices = @transform_5, window_bounds = array<i64: 1, 128>}, {pipeline_mode = #tpu.pipeline_mode<synchronous>, transform_indices = @transform_6, window_bounds = array<i64: 128, 128>}, {pipeline_mode = #tpu.pipeline_mode<synchronous>, transform_indices = @transform_7, window_bounds = array<i64: 1, 128>}, {transform_indices = @transform_8, window_bounds = array<i64: 1, 3, 256>}]} {
    %c0 = arith.constant 0 : index
    %c0_0 = arith.constant 0 : index
    %c0_1 = arith.constant 0 : index
    %0 = vector.load %arg3[%c0, %c0_0, %c0_1] : memref<1x3x256xf32, #tpu.memory_space<vmem>>, vector<1x3x256xf32>
    %1 = vector.shape_cast %0 : vector<1x3x256xf32> to vector<3x256xf32>
    %c0_2 = arith.constant 0 : index
    %c0_3 = arith.constant 0 : index
    %2 = vector.load %arg4[%c0_2, %c0_3] : memref<128x3xf32, #tpu.memory_space<vmem>>, vector<128x3xf32>
    %c0_4 = arith.constant 0 : index
    %c0_5 = arith.constant 0 : index
    %3 = vector.load %arg5[%c0_4, %c0_5] : memref<128x1xf32, #tpu.memory_space<vmem>>, vector<128x1xf32>
    %4 = vector.extract_strided_slice %2 {offsets = [0, 0], sizes = [128, 1], strides = [1, 1]} : vector<128x3xf32> to vector<128x1xf32>
    %5 = vector.extract_strided_slice %1 {offsets = [0, 0], sizes = [1, 256], strides = [1, 1]} : vector<3x256xf32> to vector<1x256xf32>
    %6 = vector.broadcast %4 : vector<128x1xf32> to vector<128x256xf32>
    %7 = vector.broadcast %5 : vector<1x256xf32> to vector<128x256xf32>
    %8 = arith.mulf %6, %7 : vector<128x256xf32>
    %9 = vector.broadcast %3 : vector<128x1xf32> to vector<128x256xf32>
    %10 = arith.addf %9, %8 : vector<128x256xf32>
    %11 = vector.extract_strided_slice %2 {offsets = [0, 1], sizes = [128, 1], strides = [1, 1]} : vector<128x3xf32> to vector<128x1xf32>
    %12 = vector.extract_strided_slice %1 {offsets = [1, 0], sizes = [1, 256], strides = [1, 1]} : vector<3x256xf32> to vector<1x256xf32>
    %13 = vector.broadcast %11 : vector<128x1xf32> to vector<128x256xf32>
    %14 = vector.broadcast %12 : vector<1x256xf32> to vector<128x256xf32>
    %15 = arith.mulf %13, %14 : vector<128x256xf32>
    %16 = arith.addf %10, %15 : vector<128x256xf32>
    %17 = vector.extract_strided_slice %2 {offsets = [0, 2], sizes = [128, 1], strides = [1, 1]} : vector<128x3xf32> to vector<128x1xf32>
    %18 = vector.extract_strided_slice %1 {offsets = [2, 0], sizes = [1, 256], strides = [1, 1]} : vector<3x256xf32> to vector<1x256xf32>
    %19 = vector.broadcast %17 : vector<128x1xf32> to vector<128x256xf32>
    %20 = vector.broadcast %18 : vector<1x256xf32> to vector<128x256xf32>
    %21 = arith.mulf %19, %20 : vector<128x256xf32>
    %22 = arith.addf %16, %21 : vector<128x256xf32>
    %cst = arith.constant 0.00999999977 : f32
    %23 = vector.broadcast %cst : f32 to vector<128x256xf32>
    %24 = arith.mulf %23, %22 : vector<128x256xf32>
    %25 = arith.maximumf %22, %24 : vector<128x256xf32>
    %26 = tpu.transpose %25, [1, 0] : vector<128x256xf32> -> vector<256x128xf32>
    %27 = arith.truncf %26 : vector<256x128xf32> to vector<256x128xbf16>
    %c0_6 = arith.constant 0 : index
    %c0_7 = arith.constant 0 : index
    %28 = vector.load %arg6[%c0_6, %c0_7] : memref<128x128xbf16, #tpu.memory_space<vmem>>, vector<128x128xbf16>
    %cst_8 = arith.constant dense<0.000000e+00> : vector<256x128xf32>
    %29 = tpu.matmul %27, %28, %cst_8 {dimension_numbers = #tpu.dot_dimension_numbers<[1], [0], [0], [1], [0, 0, 1, 1], [], []>} : vector<256x128xbf16>, vector<128x128xbf16>, vector<256x128xf32> -> vector<256x128xf32>
    %c0_9 = arith.constant 0 : index
    %c0_10 = arith.constant 0 : index
    %30 = vector.load %arg7[%c0_9, %c0_10] : memref<1x128xf32, #tpu.memory_space<vmem>>, vector<1x128xf32>
    %31 = vector.broadcast %30 : vector<1x128xf32> to vector<256x128xf32>
    %32 = arith.addf %29, %31 : vector<256x128xf32>
    %cst_11 = arith.constant 0.00999999977 : f32
    %33 = vector.broadcast %cst_11 : f32 to vector<256x128xf32>
    %34 = arith.mulf %33, %32 : vector<256x128xf32>
    %35 = arith.maximumf %32, %34 : vector<256x128xf32>
    %36 = arith.truncf %35 : vector<256x128xf32> to vector<256x128xbf16>
    %c0_12 = arith.constant 0 : index
    %c0_13 = arith.constant 0 : index
    %37 = vector.load %arg8[%c0_12, %c0_13] : memref<128x128xbf16, #tpu.memory_space<vmem>>, vector<128x128xbf16>
    %cst_14 = arith.constant dense<0.000000e+00> : vector<256x128xf32>
    %38 = tpu.matmul %36, %37, %cst_14 {dimension_numbers = #tpu.dot_dimension_numbers<[1], [0], [0], [1], [0, 0, 1, 1], [], []>} : vector<256x128xbf16>, vector<128x128xbf16>, vector<256x128xf32> -> vector<256x128xf32>
    %c0_15 = arith.constant 0 : index
    %c0_16 = arith.constant 0 : index
    %39 = vector.load %arg9[%c0_15, %c0_16] : memref<1x128xf32, #tpu.memory_space<vmem>>, vector<1x128xf32>
    %40 = vector.broadcast %39 : vector<1x128xf32> to vector<256x128xf32>
    %41 = arith.addf %38, %40 : vector<256x128xf32>
    %42 = tpu.transpose %41, [1, 0] : vector<256x128xf32> -> vector<128x256xf32>
    %c0_17 = arith.constant 0 : index
    %c0_18 = arith.constant 0 : index
    %43 = memref.load %arg2[%c0_17, %c0_18] : memref<1x1xf32, #tpu.memory_space<smem>>
    %44 = vector.broadcast %43 : f32 to vector<3x256xf32>
    %45 = arith.mulf %44, %1 : vector<3x256xf32>
    %46 = vector.extract_strided_slice %42 {offsets = [0, 0], sizes = [3, 256], strides = [1, 1]} : vector<128x256xf32> to vector<3x256xf32>
    %47 = arith.addf %45, %46 : vector<3x256xf32>
    %c0_19 = arith.constant 0 : index
    %c0_20 = arith.constant 0 : index
    %c0_21 = arith.constant 0 : index
    %48 = vector.load %arg10[%c0_19, %c0_20, %c0_21] : memref<1x3x256xf32, #tpu.memory_space<vmem>>, vector<1x3x256xf32>
    %49 = vector.shape_cast %48 : vector<1x3x256xf32> to vector<3x256xf32>
    %50 = vector.shape_cast %47 : vector<3x256xf32> to vector<1x3x256xf32>
    tpu.vector_store %arg10[%c0_19, %c0_20, %c0_21], %50 {strides = array<i32>} : memref<1x3x256xf32, #tpu.memory_space<vmem>>, vector<1x3x256xf32>,
    return
  }
  func.func @transform_0(%arg0: i32, %arg1: i32) -> (i32, i32) {
    %c0_i32 = arith.constant 0 : i32
    %c0_i32_0 = arith.constant 0 : i32
    %c0_i32_1 = arith.constant 0 : i32
    return %c0_i32, %c0_i32_0 : i32, i32
  }
  func.func @transform_1(%arg0: i32, %arg1: i32) -> (i32, i32, i32) {
    %c0_i32 = arith.constant 0 : i32
    %c0_i32_0 = arith.constant 0 : i32
    return %arg0, %c0_i32, %arg1 : i32, i32, i32
  }
  func.func @transform_2(%arg0: i32, %arg1: i32) -> (i32, i32) {
    %c0_i32 = arith.constant 0 : i32
    %c0_i32_0 = arith.constant 0 : i32
    %c0_i32_1 = arith.constant 0 : i32
    return %c0_i32, %c0_i32_0 : i32, i32
  }
  func.func @transform_3(%arg0: i32, %arg1: i32) -> (i32, i32) {
    %c0_i32 = arith.constant 0 : i32
    %c0_i32_0 = arith.constant 0 : i32
    %c0_i32_1 = arith.constant 0 : i32
    return %c0_i32, %c0_i32_0 : i32, i32
  }
  func.func @transform_4(%arg0: i32, %arg1: i32) -> (i32, i32) {
    %c0_i32 = arith.constant 0 : i32
    %c0_i32_0 = arith.constant 0 : i32
    %c0_i32_1 = arith.constant 0 : i32
    return %c0_i32, %c0_i32_0 : i32, i32
  }
  func.func @transform_5(%arg0: i32, %arg1: i32) -> (i32, i32) {
    %c0_i32 = arith.constant 0 : i32
    %c0_i32_0 = arith.constant 0 : i32
    %c0_i32_1 = arith.constant 0 : i32
    return %c0_i32, %c0_i32_0 : i32, i32
  }
  func.func @transform_6(%arg0: i32, %arg1: i32) -> (i32, i32) {
    %c0_i32 = arith.constant 0 : i32
    %c0_i32_0 = arith.constant 0 : i32
    %c0_i32_1 = arith.constant 0 : i32
    return %c0_i32, %c0_i32_0 : i32, i32
  }
  func.func @transform_7(%arg0: i32, %arg1: i32) -> (i32, i32) {
    %c0_i32 = arith.constant 0 : i32
    %c0_i32_0 = arith.constant 0 : i32
    %c0_i32_1 = arith.constant 0 : i32
    return %c0_i32, %c0_i32_0 : i32, i32
  }
  func.func @transform_8(%arg0: i32, %arg1: i32) -> (i32, i32, i32) {
    %c0_i32 = arith.constant 0 : i32
    %c0_i32_0 = arith.constant 0 : i32
    return %arg0, %c0_i32, %arg1 : i32, i32, i32
  }
}

</mosaic_0001>

<bundles_post_ra>
// kernel: tpu_custom_call.1
= control target key start
LH: loop header
LB: loop body
LE: loop exit
PB: predicated region body
PF: predicated region fallthrough
CT: control target
= control target key end

     0   :  { %s2099_s29 = smov 0   ;;  %s2101_s30 = smov 0   ;;  %s2655_s0 = inlined_call_operand.<no memory space> [shape: f32[1,1], index: 0, kind: input, shape index: {}]   ;;  %s2656_s1 = inlined_call_operand.vmem [shape: f32[2,3,256], index: 1, kind: input, shape index: {}]   ;;  %s2657_s2 = inlined_call_operand.vmem [shape: f32[128,3], index: 2, kind: input, shape index: {}]   ;;  %s2658_s3 = inlined_call_operand.vmem [shape: f32[128,1], index: 3, kind: input, shape index: {}]   ;;  %s2659_s4 = inlined_call_operand.vmem [shape: bf16[128,128], index: 4, kind: input, shape index: {}]   ;;  %s2660_s5 = inlined_call_operand.vmem [shape: f32[1,128], index: 5, kind: input, shape index: {}]   ;;  %s2661_s6 = inlined_call_operand.vmem [shape: bf16[128,128], index: 6, kind: input, shape index: {}]   ;;  %s2662_s7 = inlined_call_operand.vmem [shape: f32[1,128], index: 7, kind: input, shape index: {}]   ;;  %s2663_s8 = inlined_call_operand.vmem [shape: f32[2,3,256], index: 8, kind: output, shape index: {}]  }
   0x1   :  { %13 = sst [smem:[#allocation2]] %s2655_s0  ;;  %s2103_s9 = smov 0  }
   0x2 LB: > { %s31_s0 = sadd.s32 1, %s2042_s30  ;;  %p1767_p0 = scmp.ge.s32.totalorder %s2046_s9, 1  ;;  %s2046_s9 = sphi %s2103_s9, %s19_s9   ;;  %s2042_s30 = sphi %s2101_s30, %s2665_s30   ;;  %s2038_s29 = sphi %s2099_s29, %s2664_s29  }
   0x3   : > { %p33_p1 = scmp.ge.s32.totalorder %s31_s0, 2  ;;  %p284_p2 = scmp.lt.s32.totalorder %s2046_s9, 3 }
   0x5   : > { %s2667_s0 = smov (%p33_p1, %s31_s0), 0  ;;  %p285_p3 = pnand %p1767_p0, %p284_p2 }
   0x6   : > { %v364_v0 = vld [vmem:[%s2658_s3] sm:$0xff] (!%p285_p3)  ;;  %v349_v1 = vld [vmem:[%s2657_s2 + $0x8] sm:$0xff] (!%p285_p3)  ;;  %v2048_v2 = vmov (!%p285_p3), 1   ;;  %v2049_v3 = vmov (!%p285_p3), 0   ;;  %v351_v4 = vld [vmem:[%s2657_s2 + $0x18] sm:$0xff] (!%p285_p3)  ;;  %v2050_v10 = vmov (!%p285_p3), 2   ;;  %v461_v39 = vlaneseq (!%p285_p3) }
   0x7   : > { %288 = sbr.rel (%p285_p3) target bundleno = 1046 (0x416), region = 52  ;;  %1968 = vset.pattern.permute.xlu0 (!%p285_p3), %v2048_v2  ;;  %1965 = vset.pattern.permute.xlu1 (!%p285_p3), %v2049_v3  ;;  %v348_v5 = vld [vmem:[%s2657_s2] sm:$0xff] (!%p285_p3)  ;;  %v2137_v6 = vld [vmem:[%s2657_s2 + $0x28] sm:$0xff] (!%p285_p3)  ;;  %v2147_v8 = vld [vmem:[%s2657_s2 + $0x38] sm:$0xff] (!%p285_p3)  ;;  %p327_p4 = scmp.lt.s32.totalorder (!%p285_p3), %s2038_s29, 1 }
   0x8   : > { %513 = vperm.xlu1 (!%p285_p3), %1965, %v364_v0   ;;  %628 = vperm.xlu0 (!%p285_p3), %1968, %v349_v1   ;;  %v365_v7 = vld [vmem:[%s2658_s3 + $0x8] sm:$0xff] (!%p285_p3)  ;;  %v2159_v11 = vld [vmem:[%s2657_s2 + $0x58] sm:$0xff] (!%p285_p3)  ;;  %v350_v13 = vld [vmem:[%s2657_s2 + $0x10] sm:$0xff] (!%p285_p3)  ;;  %v462_v42 = vshrl.u32 (!%p285_p3), %v461_v39, 7  ;;  %s1667_s23 = sld [smem:[#allocation2]] (!%p285_p3) }
   0x9   : > { %v2152_v9 = vld [vmem:[%s2657_s2 + $0x48] sm:$0xff] (!%p285_p3)  ;;  %v367_v14 = vld [vmem:[%s2658_s3 + $0x18] sm:$0xff] (!%p285_p3)  ;;  %v366_v15 = vld [vmem:[%s2658_s3 + $0x10] sm:$0xff] (!%p285_p3) }
   0xa   : > { %v2167_v12 = vld [vmem:[%s2657_s2 + $0x68] sm:$0xff] (!%p285_p3)  ;;  %v352_v16 = vld [vmem:[%s2657_s2 + $0x20] sm:$0xff] (!%p285_p3)  ;;  %v354_v18 = vld [vmem:[%s2657_s2 + $0x30] sm:$0xff] (!%p285_p3)  ;;  %v689_v44 = vsub.s32 (!%p285_p3), 1, %v462_v42  ;;  %v693_v45 = vsub.s32 (!%p285_p3), 5, %v462_v42  ;;  %v463_v46 = vsub.s32 (!%p285_p3), 0, %v462_v42 }
   0xb   : > { %v368_v17 = vld [vmem:[%s2658_s3 + $0x20] sm:$0xff] (!%p285_p3)  ;;  %v370_v19 = vld [vmem:[%s2658_s3 + $0x30] sm:$0xff] (!%p285_p3)  ;;  %v369_v20 = vld [vmem:[%s2658_s3 + $0x28] sm:$0xff] (!%p285_p3)  ;;  %v467_v47 = vsub.s32 (!%p285_p3), 4, %v462_v42  ;;  %v835_v51 = vsub.s32 (!%p285_p3), 2, %v462_v42  ;;  %v839_v52 = vsub.s32 (!%p285_p3), 6, %v462_v42 }
   0xc   : > { %1966 = vset.pattern.permute.xlu1 (!%p285_p3), %v2048_v2  ;;  %636 = vperm.xlu0 (!%p285_p3), %1968, %v351_v4   ;;  %v356_v21 = vld [vmem:[%s2657_s2 + $0x40] sm:$0xff] (!%p285_p3)  ;;  %v358_v23 = vld [vmem:[%s2657_s2 + $0x50] sm:$0xff] (!%p285_p3)  ;;  %v371_v27 = vld [vmem:[%s2658_s3 + $0x38] sm:$0xff] (!%p285_p3) }
   0xd   : > { %624 = vperm.xlu1 (!%p285_p3), %1966, %v348_v5   ;;  %v372_v22 = vld [vmem:[%s2658_s3 + $0x40] sm:$0xff] (!%p285_p3)  ;;  %v374_v24 = vld [vmem:[%s2658_s3 + $0x50] sm:$0xff] (!%p285_p3)  ;;  %v379_v30 = vld [vmem:[%s2658_s3 + $0x78] sm:$0xff] (!%p285_p3) }
   0xe   : > { %v2223_v25 = vld [vmem:[%s2657_s2 + $0x60] sm:$0xff]  ;;  %v2237_v28 = vld [vmem:[%s2657_s2 + $0x70] sm:$0xff]  ;;  %v373_v31 = vld [vmem:[%s2658_s3 + $0x48] sm:$0xff]  ;;  %s2669_s29 = smov (!%p327_p4, %s2038_s29), 1 }
   0xf   : > { %v376_v26 = vld [vmem:[%s2658_s3 + $0x60] sm:$0xff]  ;;  %v378_v29 = vld [vmem:[%s2658_s3 + $0x70] sm:$0xff]  ;;  %v375_v36 = vld [vmem:[%s2658_s3 + $0x58] sm:$0xff]  ;;  %s1792_s13 = sshll.u32 %s2669_s29, 3 }
  0x10   : > { %644 = vperm.xlu0 %1968, %v2137_v6   ;;  %s2291_s16 = scalar_lea.vmem %s2656_s1, %s1792_s13  ;;  %s344_s26 = scalar_lea.vmem %s2663_s8, %s1792_s13 }
  0x11   : > { %1967 = vset.pattern.permute.xlu1 %v2049_v3  ;;  %v347_v50 = vld [vmem:[%s2291_s16] sm:$0x77] }
  0x12   : > { %518 = vperm.xlu1 %1967, %v365_v7   ;;  %v690_v53 = vrot.slane %v347_v50, %v689_v44  ;;  %v694_v54 = vrot.slane %v347_v50, %v693_v45  ;;  %v464_v55 = vrot.slane %v347_v50, %v463_v46  ;;  %v468_v56 = vrot.slane %v347_v50, %v467_v47 }
  0x13   : > { %v836_v58 = vrot.slane %v347_v50, %v835_v51  ;;  %v840_v60 = vrot.slane %v347_v50, %v839_v52  ;;  %v363_v50 = vld [vmem:[%s2657_s2 + $0x78] sm:$0xff] }
  0x14   : > { %652 = vperm.xlu0 %1968, %v2147_v8   ;;  %v2306_v61 = vrot.slane %v690_v53, %v689_v44  ;;  %v2308_v62 = vrot.slane %v694_v54, %v689_v44  ;;  %v2310_v63 = vrot.slane %v464_v55, %v463_v46  ;;  %v2312_v0 = vrot.slane %v468_v56, %v463_v46 }
  0x16   : > { %1969 = vset.pattern.permute.xlu1 %v2050_v10 }
  0x17   : > { %770 = vperm.xlu1 %1969, %v348_v5  }
  0x18   : > { %660 = vperm.xlu0 %1968, %v2152_v9  }
  0x1b   : > { %1970 = vset.pattern.permute.xlu1 %v2049_v3 }
  0x1c   : > { %668 = vperm.xlu0 %1968, %v2159_v11   ;;  %397 = vperm.xlu1 %1970, %v351_v4  }
  0x20   : > { %676 = vperm.xlu0 %1968, %v2167_v12   ;;  %1971 = vset.pattern.permute.xlu1 %v2048_v2 }
  0x21   : > { %632 = vperm.xlu1 %1971, %v350_v13  }
  0x24   : > { %1999 = vset.pattern.permute.xlu0 %v2049_v3 }
  0x25   : > { %382 = vperm.xlu0 %1999, %v348_v5   ;;  %1972 = vset.pattern.permute.xlu1 %v2050_v10 }
  0x26   : > { %774 = vperm.xlu1 %1972, %v349_v1  }
  0x29   : > { %387 = vperm.xlu0 %1999, %v349_v1   ;;  %v2315_v1 = vrot.slane %v836_v58, %v835_v51 }
  0x2a   : > { %1973 = vset.pattern.permute.xlu1 %v2049_v3 }
  0x2b   : > { %528 = vperm.xlu1 %1973, %v367_v14  }
  0x2d   : > { %392 = vperm.xlu0 %1999, %v350_v13  }
  0x2f   : > { %1974 = vset.pattern.permute.xlu1 %v2050_v10 }
  0x30   : > { %778 = vperm.xlu1 %1974, %v350_v13   ;;  %v2325_v13 = vrot.slane %v840_v60, %v835_v51 }
  0x31   : > { %523 = vperm.xlu0 %1999, %v366_v15  }
  0x34   : > { %1975 = vset.pattern.permute.xlu1 %v2049_v3 }
  0x35   : > { %407 = vperm.xlu1 %1975, %v2137_v6   ;;  %402 = vperm.xlu0 %1999, %v352_v16  }
  0x39   : > { %1976 = vset.pattern.permute.xlu1 %v2048_v2  ;;  %533 = vperm.xlu0 %1999, %v368_v17  }
  0x3a   : > { %640 = vperm.xlu1 %1976, %v352_v16  }
  0x3d   : > { %412 = vperm.xlu0 %1999, %v354_v18  }
  0x3e   : > { %1977 = vset.pattern.permute.xlu1 %v2050_v10 }
  0x3f   : > { %782 = vperm.xlu1 %1977, %v351_v4  }
  0x41   : > { %543 = vperm.xlu0 %1999, %v370_v19  }
  0x43   : > { %1978 = vset.pattern.permute.xlu1 %v2049_v3 }
  0x44   : > { %538 = vperm.xlu1 %1978, %v369_v20  }
  0x45   : > { %422 = vperm.xlu0 %1999, %v356_v21  }
  0x48   : > { %1979 = vset.pattern.permute.xlu1 %v2050_v10 }
  0x49   : > { %786 = vperm.xlu1 %1979, %v352_v16   ;;  %553 = vperm.xlu0 %1999, %v372_v22  }
  0x4d   : > { %1980 = vset.pattern.permute.xlu1 %v2049_v3  ;;  %432 = vperm.xlu0 %1999, %v358_v23  }
  0x4e   : > { %417 = vperm.xlu1 %1980, %v2147_v8  }
  0x51   : > { %563 = vperm.xlu0 %1999, %v374_v24  }
  0x52   : > { %1981 = vset.pattern.permute.xlu1 %v2048_v2 }
  0x53   : > { %648 = vperm.xlu1 %1981, %v354_v18  }
  0x55   : > { %442 = vperm.xlu0 %1999, %v2223_v25  }
  0x57   : > { %1982 = vset.pattern.permute.xlu1 %v2050_v10 }
  0x58   : > { %790 = vperm.xlu1 %1982, %v2137_v6  }
  0x59   : > { %573 = vperm.xlu0 %1999, %v376_v26  }
  0x5c   : > { %1983 = vset.pattern.permute.xlu1 %v2049_v3 }
  0x5d   : > { %548 = vperm.xlu1 %1983, %v371_v27   ;;  %452 = vperm.xlu0 %1999, %v2237_v28  }
  0x61   : > { %1984 = vset.pattern.permute.xlu1 %v2050_v10  ;;  %583 = vperm.xlu0 %1999, %v378_v29  }
  0x62   : > { %794 = vperm.xlu1 %1984, %v354_v18  }
  0x65   : > { %588 = vperm.xlu0 %1999, %v379_v30  }
  0x66   : > { %1985 = vset.pattern.permute.xlu1 %v2049_v3 }
  0x67   : > { %427 = vperm.xlu1 %1985, %v2152_v9  }
  0x69   : > { %2005 = vset.pattern.permute.xlu0 %v2050_v10 }
  0x6a   : > { %826 = vperm.xlu0 %2005, %v2237_v28  }
  0x6b   : > { %1986 = vset.pattern.permute.xlu1 %v2048_v2 }
  0x6c   : > { %656 = vperm.xlu1 %1986, %v356_v21  }
  0x70   : > { %1987 = vset.pattern.permute.xlu1 %v2050_v10 }
  0x71   : > { %798 = vperm.xlu1 %1987, %v2147_v8   ;;  %v377_v8 = vld [vmem:[%s2658_s3 + $0x68] sm:$0xff] }
  0x75   : > { %1988 = vset.pattern.permute.xlu1 %v2049_v3 }
  0x76   : > { %558 = vperm.xlu1 %1988, %v373_v31  }
  0x7a   : > { %1989 = vset.pattern.permute.xlu1 %v2050_v10 }
  0x7b   : > { %802 = vperm.xlu1 %1989, %v356_v21  }
  0x7f   : > { %1990 = vset.pattern.permute.xlu1 %v2049_v3 }
  0x80   : > { %437 = vperm.xlu1 %1990, %v2159_v11  }
  0x84   : > { %1991 = vset.pattern.permute.xlu1 %v2048_v2 }
  0x85   : > { %664 = vperm.xlu1 %1991, %v358_v23  }
  0x87   : > { %v514_v32 = vpop.permute.xlu1 %513  ;;  %v629_v33 = vpop.permute.xlu0 %628 }
  0x88   : > { %v708_v17 = vmul.f32 %v2308_v62, %v629_v33 }
  0x89   : > { %1992 = vset.pattern.permute.xlu1 %v2050_v10 }
  0x8a   : > { %806 = vperm.xlu1 %1992, %v2152_v9   ;;  %v707_v9 = vmul.f32 %v2306_v61, %v629_v33 }
  0x8b   : > { %v2265_v34 = vpop.permute.xlu0 %636 }
  0x8c   : > { %v625_v35 = vpop.permute.xlu1 %624  ;;  %v711_v18 = vmul.f32 %v2306_v61, %v2265_v34 }
  0x8d   : > { %v705_v14 = vmul.f32 %v2306_v61, %v625_v35 }
  0x8e   : > { %1993 = vset.pattern.permute.xlu1 %v2049_v3 }
  0x8f   : > { %568 = vperm.xlu1 %1993, %v375_v36   ;;  %v2272_v37 = vpop.permute.xlu0 %644 }
  0x91   : > { %v2274_v38 = vpop.permute.xlu1 %518 }
  0x93   : > { %1994 = vset.pattern.permute.xlu1 %v2050_v10  ;;  %v2280_v40 = vpop.permute.xlu0 %652 }
  0x94   : > { %810 = vperm.xlu1 %1994, %v358_v23  }
  0x96   : > { %v771_v41 = vpop.permute.xlu1 %770 }
  0x97   : > { %v2283_v43 = vpop.permute.xlu0 %660  ;;  %v851_v19 = vmul.f32 %v2315_v1, %v771_v41  ;;  %v852_v27 = vmul.f32 %v2325_v13, %v771_v41 }
  0x98   : > { %1995 = vset.pattern.permute.xlu1 %v2049_v3 }
  0x99   : > { %447 = vperm.xlu1 %1995, %v2167_v12  }
  0x9b   : > { %v2294_v48 = vpop.permute.xlu1 %397  ;;  %v2296_v49 = vpop.permute.xlu0 %668 }
  0x9c   : > { %v485_v20 = vmul.f32 %v2310_v63, %v2294_v48 }
  0x9d   : > { %1996 = vset.pattern.permute.xlu1 %v2048_v2 }
  0x9e   : > { %672 = vperm.xlu1 %1996, %v2223_v25  }
  0x9f   : > { %v2301_v57 = vpop.permute.xlu0 %676 }
  0xa0   : > { %v2303_v59 = vpop.permute.xlu1 %632 }
  0xa1   : > { %v710_v53 = vmul.f32 %v2308_v62, %v2303_v59 }
  0xa2   : > { %1997 = vset.pattern.permute.xlu1 %v2050_v10 }
  0xa3   : > { %814 = vperm.xlu1 %1997, %v2159_v11   ;;  %v706_v11 = vmul.f32 %v2308_v62, %v625_v35 }
  0xa4   : > { %v383_v4 = vpop.permute.xlu0 %382 }
  0xa5   : > { %v479_v5 = vmul.f32 %v2310_v63, %v383_v4  ;;  %v480_v6 = vmul.f32 %v2312_v0, %v383_v4  ;;  %v2319_v7 = vpop.permute.xlu1 %774 }
  0xa6   : > { %v854_v39 = vmul.f32 %v2325_v13, %v2319_v7 }
  0xa7   : > { %v591_v15 = vadd.f32 %v514_v32, %v479_v5  ;;  %v592_v16 = vadd.f32 %v514_v32, %v480_v6  ;;  %1998 = vset.pattern.permute.xlu1 %v2049_v3  ;;  %v486_v6 = vmul.f32 %v2312_v0, %v2294_v48 }
  0xa8   : > { %v388_v21 = vpop.permute.xlu0 %387  ;;  %578 = vperm.xlu1 %1998, %v377_v8  }
  0xa9   : > { %v737_v22 = vadd.f32 %v705_v14, %v591_v15  ;;  %v738_v23 = vadd.f32 %v706_v11, %v592_v16  ;;  %v481_v24 = vmul.f32 %v2310_v63, %v388_v21  ;;  %v482_v26 = vmul.f32 %v2312_v0, %v388_v21 }
  0xaa   : > { %v529_v29 = vpop.permute.xlu1 %528 }
  0xab   : > { %v2339_v30 = vadd.f32 %v851_v19, %v737_v22  ;;  %v593_v31 = vadd.f32 %v2274_v38, %v481_v24  ;;  %v594_v32 = vadd.f32 %v2274_v38, %v482_v26  ;;  %v597_v33 = vadd.f32 %v529_v29, %v485_v20 }
  0xac   : > { %v2343_v35 = vpop.permute.xlu0 %392  ;;  %2000 = vset.pattern.permute.xlu1 %v2050_v10  ;;  %v884_v36 = vadd.f32 %v852_v27, %v738_v23  ;;  %v598_v14 = vadd.f32 %v529_v29, %v486_v6 }
  0xad   : > { %v2348_v42 = vadd.f32 %v707_v9, %v593_v31  ;;  %v740_v44 = vadd.f32 %v708_v17, %v594_v32  ;;  %v2350_v41 = vadd.f32 %v711_v18, %v597_v33  ;;  %818 = vperm.xlu1 %2000, %v2223_v25   ;;  %v484_v45 = vmul.f32 %v2312_v0, %v2343_v35 }
  0xae   : > { %v916_v38 = vmul.f32 0.01, %v884_v36  ;;  %v712_v9 = vmul.f32 %v2308_v62, %v2265_v34  ;;  %v715_v17 = vmul.f32 %v2306_v61, %v2272_v37 }
  0xaf   : > { %v886_v46 = vadd.f32 %v854_v39, %v740_v44  ;;  %v2355_v47 = vpop.permute.xlu1 %778 }
  0xb0   : > { %v2360_v51 = vpop.permute.xlu0 %523  ;;  %v948_v52 = vmax.f32 %v884_v36, %v916_v38  ;;  %v856_v55 = vmul.f32 %v2325_v13, %v2355_v47  ;;  %v2007_v36 = vld [vmem:[%s2659_s4] sm:$0xff]   ;;  %v2009_v38 = vld [vmem:[%s2659_s4 + $0x10] sm:$0xff]  }
  0xb1   : > { %v596_v54 = vadd.f32 %v2360_v51, %v484_v45  ;;  %2001 = vset.pattern.permute.xlu1 %v2049_v3  ;;  %v918_v25 = vmul.f32 0.01, %v886_v46  ;;  %1842 = vmatprep.subr.bf16.mxu0 %v2007_v36 }
  0xb2   : > { %1011 = vxpose.xlu0.b32.start [1/16] %v948_v52, 128  ;;  %457 = vperm.xlu1 %2001, %v363_v50  }
  0xb3   : > { %v742_v56 = vadd.f32 %v710_v53, %v596_v54  ;;  %v950_v58 = vmax.f32 %v886_v46, %v918_v25  ;;  %1843 = vmatpush3.bf16.msra.mxu0 %v2007_v36  ;;  %v716_v46 = vmul.f32 %v2308_v62, %v2272_v37  ;;  %v2010_v53 = vld [vmem:[%s2659_s4 + $0x18] sm:$0xff]   ;;  %v2011_v37 = vld [vmem:[%s2659_s4 + $0x20] sm:$0xff]  }
  0xb4   : > { %v408_v60 = vpop.permute.xlu1 %407  ;;  %v2377_v11 = vpop.permute.xlu0 %402 }
  0xb5   : > { %v888_v4 = vadd.f32 %v856_v55, %v742_v56  ;;  %v488_v16 = vmul.f32 %v2312_v0, %v2377_v11  ;;  %v489_v18 = vmul.f32 %v2310_v63, %v408_v60  ;;  %v490_v44 = vmul.f32 %v2312_v0, %v408_v60 }
  0xb6   : > { %1012 = vxpose.xlu0.b32.cont [2/16] %v950_v58, 128  ;;  %2002 = vset.pattern.permute.xlu1 %v2048_v2 }
  0xb7   : > { %v920_v5 = vmul.f32 0.01, %v888_v4  ;;  %680 = vperm.xlu1 %2002, %v2237_v28   ;;  %v744_v28 = vadd.f32 %v712_v9, %v598_v14  ;;  %v483_v14 = vmul.f32 %v2310_v63, %v2343_v35 }
  0xb8   : > { %v2390_v19 = vpop.permute.xlu0 %533 }
  0xb9   : > { %v2372_v3 = vpop.permute.xlu1 %640  ;;  %v952_v8 = vmax.f32 %v888_v4, %v920_v5  ;;  %v600_v22 = vadd.f32 %v2390_v19, %v488_v16 }
  0xbb   : > { %2003 = vset.pattern.permute.xlu1 %v2050_v10  ;;  %1013 = vxpose.xlu0.b32.cont [3/16] %v952_v8, 128 }
  0xbc   : > { %822 = vperm.xlu1 %2003, %v2167_v12   ;;  %v413_v52 = vpop.permute.xlu0 %412 }
  0xbd   : > { %v492_v56 = vmul.f32 %v2312_v0, %v413_v52 }
  0xbe   : > { %v2380_v15 = vpop.permute.xlu1 %782 }
  0xbf   : > { %v858_v48 = vmul.f32 %v2325_v13, %v2380_v15 }
  0xc0   : > { %2004 = vset.pattern.permute.xlu1 %v2048_v2  ;;  %v714_v2 = vmul.f32 %v2308_v62, %v2372_v3  ;;  %v544_v60 = vpop.permute.xlu0 %543 }
  0xc1   : > { %v890_v34 = vadd.f32 %v858_v48, %v744_v28  ;;  %684 = vperm.xlu1 %2004, %v363_v50   ;;  %v604_v6 = vadd.f32 %v544_v60, %v492_v56 }
  0xc2   : > { %v746_v27 = vadd.f32 %v714_v2, %v600_v22 }
  0xc3   : > { %v922_v12 = vmul.f32 0.01, %v890_v34  ;;  %v539_v20 = vpop.permute.xlu1 %538 }
  0xc4   : > { %v601_v21 = vadd.f32 %v539_v20, %v489_v18  ;;  %v709_v18 = vmul.f32 %v2306_v61, %v2303_v59 }
  0xc5   : > { %v954_v23 = vmax.f32 %v890_v34, %v922_v12  ;;  %2006 = vset.pattern.permute.xlu1 %v2050_v10  ;;  %v2008_v10 = vld [vmem:[%s2659_s4 + $0x8] sm:$0xff]   ;;  %v595_v34 = vadd.f32 %v2360_v51, %v483_v14  ;;  %v853_v12 = vmul.f32 %v2315_v1, %v2319_v7  ;;  %v487_v51 = vmul.f32 %v2310_v63, %v2377_v11 }
  0xc6   : > { %v2396_v24 = vadd.f32 %v715_v17, %v601_v21  ;;  %830 = vperm.xlu1 %2006, %v363_v50   ;;  %1844 = vmatprep.subr.bf16.mxu0 %v2008_v10  ;;  %v602_v50 = vadd.f32 %v539_v20, %v490_v44  ;;  %v713_v11 = vmul.f32 %v2306_v61, %v2372_v3  ;;  %v423_v44 = vpop.permute.xlu0 %422 }
  0xc7   : > { %1014 = vxpose.xlu0.b32.cont [4/16] %v954_v23, 128  ;;  %1845 = vmatpush3.bf16.msra.mxu0 %v2008_v10  ;;  %v885_v35 = vadd.f32 %v853_v12, %v2348_v42  ;;  %v741_v22 = vadd.f32 %v709_v18, %v595_v34  ;;  %v915_v23 = vmul.f32 0.01, %v2339_v30  ;;  %v720_v42 = vmul.f32 %v2308_v62, %v2280_v40 }
  0xc8   : > { %v2398_v26 = vpop.permute.xlu1 %786  ;;  %1846 = vmatprep.subr.bf16.mxu0 %v2009_v38  ;;  %v748_v25 = vadd.f32 %v716_v46, %v602_v50  ;;  %v599_v10 = vadd.f32 %v2390_v19, %v487_v51  ;;  %v496_v19 = vmul.f32 %v2312_v0, %v423_v44 }
  0xc9   : > { %v860_v29 = vmul.f32 %v2325_v13, %v2398_v26 }
  0xcb   : > { %v892_v31 = vadd.f32 %v860_v29, %v746_v27  ;;  %1847 = vmatpush3.bf16.msra.mxu0 %v2009_v38  ;;  %v855_v27 = vmul.f32 %v2315_v1, %v2355_v47  ;;  %v947_v47 = vmax.f32 %v2339_v30, %v915_v23  ;;  %v491_v30 = vmul.f32 %v2310_v63, %v413_v52 }
  0xcc   : > { %1848 = vmatprep.subr.bf16.mxu0 %v2010_v53 }
  0xcd   : > { %v924_v32 = vmul.f32 0.01, %v892_v31  ;;  %v2402_v33 = vpop.permute.xlu1 %417  ;;  %v887_v29 = vadd.f32 %v855_v27, %v741_v22 }
  0xce   : > { %v494_v59 = vmul.f32 %v2312_v0, %v2402_v33 }
  0xcf   : > { %v956_v39 = vmax.f32 %v892_v31, %v924_v32  ;;  %1849 = vmatpush3.bf16.msra.mxu0 %v2010_v53  ;;  %v917_v31 = vmul.f32 0.01, %v885_v35  ;;  %v857_v32 = vmul.f32 %v2315_v1, %v2380_v15  ;;  %v859_v53 = vmul.f32 %v2315_v1, %v2398_v26 }
  0xd0   : > { %1850 = vmatprep.subr.bf16.mxu0 %v2011_v37 }
  0xd1   : > { %1015 = vxpose.xlu0.b32.cont [5/16] %v956_v39, 128  ;;  %v919_v39 = vmul.f32 0.01, %v887_v29  ;;  %v949_v46 = vmax.f32 %v885_v35, %v917_v31  ;;  %v889_v50 = vadd.f32 %v857_v32, %v2350_v41 }
  0xd2   : > { %v2411_v45 = vpop.permute.xlu1 %648 }
  0xd3   : > { %v718_v8 = vmul.f32 %v2308_v62, %v2411_v45  ;;  %1851 = vmatpush3.bf16.msra.mxu0 %v2011_v37  ;;  %v951_v41 = vmax.f32 %v887_v29, %v919_v39  ;;  %v717_v26 = vmul.f32 %v2306_v61, %v2411_v45  ;;  %v495_v45 = vmul.f32 %v2310_v63, %v423_v44 }
  0xd5   : > { %v750_v48 = vadd.f32 %v718_v8, %v604_v6  ;;  %v603_v8 = vadd.f32 %v544_v60, %v491_v30  ;;  %v719_v60 = vmul.f32 %v2306_v61, %v2280_v40 }
  0xd7   : > { %v791_v54 = vpop.permute.xlu1 %790 }
  0xd8   : > { %v862_v55 = vmul.f32 %v2325_v13, %v791_v54  ;;  %v861_v3 = vmul.f32 %v2315_v1, %v791_v54  ;;  %v493_v54 = vmul.f32 %v2310_v63, %v2402_v33 }
  0xda   : > { %v894_v58 = vadd.f32 %v862_v55, %v748_v25  ;;  %v745_v55 = vadd.f32 %v713_v11, %v599_v10 }
  0xdc   : > { %v926_v4 = vmul.f32 0.01, %v894_v58  ;;  %v2426_v5 = vpop.permute.xlu1 %548  ;;  %v891_v37 = vadd.f32 %v859_v53, %v745_v55 }
  0xdd   : > { %v606_v36 = vadd.f32 %v2426_v5, %v494_v59  ;;  %v605_v35 = vadd.f32 %v2426_v5, %v493_v54 }
  0xde   : > { %v958_v9 = vmax.f32 %v894_v58, %v926_v4  ;;  %v921_v58 = vmul.f32 0.01, %v889_v50 }
  0xdf   : > { %v752_v15 = vadd.f32 %v720_v42, %v606_v36  ;;  %v751_v51 = vadd.f32 %v719_v60, %v605_v35  ;;  %v2012_v60 = vld [vmem:[%s2659_s4 + $0x28] sm:$0xff]  }
  0xe0   : > { %1016 = vxpose.xlu0.b32.cont [6/16] %v958_v9, 128  ;;  %v554_v9 = vpop.permute.xlu0 %553  ;;  %v953_v34 = vmax.f32 %v889_v50, %v921_v58  ;;  %1852 = vmatprep.subr.bf16.mxu0 %v2012_v60 }
  0xe1   : > { %v795_v28 = vpop.permute.xlu1 %794  ;;  %v608_v14 = vadd.f32 %v554_v9, %v496_v19  ;;  %v607_v59 = vadd.f32 %v554_v9, %v495_v45  ;;  %1853 = vmatpush3.bf16.msra.mxu0 %v2012_v60 }
  0xe2   : > { %v864_v16 = vmul.f32 %v2325_v13, %v795_v28  ;;  %v863_v18 = vmul.f32 %v2315_v1, %v795_v28 }
  0xe4   : > { %v896_v17 = vadd.f32 %v864_v16, %v750_v48  ;;  %v893_v16 = vadd.f32 %v861_v3, %v2396_v24 }
  0xe6   : > { %v928_v20 = vmul.f32 0.01, %v896_v17  ;;  %v2438_v21 = vpop.permute.xlu1 %427 }
  0xe7   : > { %v497_v11 = vmul.f32 %v2310_v63, %v2438_v21  ;;  %v498_v39 = vmul.f32 %v2312_v0, %v2438_v21 }
  0xe8   : > { %v960_v2 = vmax.f32 %v896_v17, %v928_v20  ;;  %v923_v17 = vmul.f32 0.01, %v891_v37  ;;  %v749_v20 = vadd.f32 %v717_v26, %v603_v8 }
  0xea   : > { %1017 = vxpose.xlu0.b32.cont [7/16] %v960_v2, 128  ;;  %v925_v2 = vmul.f32 0.01, %v893_v16  ;;  %v955_v23 = vmax.f32 %v891_v37, %v923_v17  ;;  %v895_v27 = vadd.f32 %v863_v18, %v749_v20  ;;  %v433_v37 = vpop.permute.xlu0 %432 }
  0xeb   : > { %v657_v7 = vpop.permute.xlu1 %656  ;;  %v499_v8 = vmul.f32 %v2310_v63, %v433_v37  ;;  %v500_v9 = vmul.f32 %v2312_v0, %v433_v37 }
  0xec   : > { %v722_v52 = vmul.f32 %v2308_v62, %v657_v7  ;;  %v721_v40 = vmul.f32 %v2306_v61, %v657_v7  ;;  %v957_v42 = vmax.f32 %v893_v16, %v925_v2  ;;  %v927_v5 = vmul.f32 0.01, %v895_v27 }
  0xee   : > { %v754_v22 = vadd.f32 %v722_v52, %v608_v14  ;;  %v753_v10 = vadd.f32 %v721_v40, %v607_v59  ;;  %v959_v44 = vmax.f32 %v895_v27, %v927_v5  ;;  %v564_v17 = vpop.permute.xlu0 %563 }
  0xef   : > { %979 = vxpose.xlu1.b32.start [1/16] %v947_v47, 128  ;;  %v611_v54 = vadd.f32 %v564_v17, %v499_v8  ;;  %v612_v18 = vadd.f32 %v564_v17, %v500_v9 }
  0xf0   : > { %v799_v38 = vpop.permute.xlu1 %798 }
  0xf1   : > { %v866_v25 = vmul.f32 %v2325_v13, %v799_v38  ;;  %v865_v33 = vmul.f32 %v2315_v1, %v799_v38 }
  0xf3   : > { %v898_v56 = vadd.f32 %v866_v25, %v752_v15  ;;  %980 = vxpose.xlu1.b32.cont [2/16] %v949_v46, 128  ;;  %v897_v32 = vadd.f32 %v865_v33, %v751_v51  ;;  %v723_v15 = vmul.f32 %v2306_v61, %v2283_v43  ;;  %v724_v25 = vmul.f32 %v2308_v62, %v2283_v43  ;;  %v443_v51 = vpop.permute.xlu0 %442 }
  0xf5   : > { %v930_v4 = vmul.f32 0.01, %v898_v56  ;;  %v559_v6 = vpop.permute.xlu1 %558  ;;  %v929_v38 = vmul.f32 0.01, %v897_v32 }
  0xf6   : > { %v609_v50 = vadd.f32 %v559_v6, %v497_v11  ;;  %v610_v53 = vadd.f32 %v559_v6, %v498_v39  ;;  %v727_v11 = vmul.f32 %v2306_v61, %v2296_v49  ;;  %v728_v39 = vmul.f32 %v2308_v62, %v2296_v49 }
  0xf7   : > { %v962_v48 = vmax.f32 %v898_v56, %v930_v4  ;;  %981 = vxpose.xlu1.b32.cont [3/16] %v951_v41, 128  ;;  %v961_v30 = vmax.f32 %v897_v32, %v929_v38 }
  0xf8   : > { %v755_v56 = vadd.f32 %v723_v15, %v609_v50  ;;  %v756_v3 = vadd.f32 %v724_v25, %v610_v53  ;;  %v503_v25 = vmul.f32 %v2310_v63, %v443_v51 }
  0xf9   : > { %1018 = vxpose.xlu0.b32.cont [8/16] %v962_v48, 128 }
  0xfa   : > { %v803_v12 = vpop.permute.xlu1 %802 }
  0xfb   : > { %v868_v24 = vmul.f32 %v2325_v13, %v803_v12  ;;  %982 = vxpose.xlu1.b32.cont [4/16] %v953_v34, 128  ;;  %v867_v36 = vmul.f32 %v2315_v1, %v803_v12 }
  0xfd   : > { %v900_v28 = vadd.f32 %v868_v24, %v754_v22  ;;  %v899_v46 = vadd.f32 %v867_v36, %v753_v10  ;;  %v574_v10 = vpop.permute.xlu0 %573 }
  0xfe   : > { %v615_v37 = vadd.f32 %v574_v10, %v503_v25 }
  0xff   : > { %v932_v29 = vmul.f32 0.01, %v900_v28  ;;  %v2478_v31 = vpop.permute.xlu1 %437  ;;  %983 = vxpose.xlu1.b32.cont [5/16] %v955_v23, 128  ;;  %v931_v55 = vmul.f32 0.01, %v899_v46  ;;  %v2013_v23 = vld [vmem:[%s2659_s4 + $0x30] sm:$0xff]  }
 0x100   : > { %1854 = vmatprep.subr.bf16.mxu0 %v2013_v23  ;;  %v502_v5 = vmul.f32 %v2312_v0, %v2478_v31 }
 0x101   : > { %v964_v47 = vmax.f32 %v900_v28, %v932_v29  ;;  %v963_v41 = vmax.f32 %v899_v46, %v931_v55  ;;  %1855 = vmatpush3.bf16.msra.mxu0 %v2013_v23  ;;  %v2014_v29 = vld [vmem:[%s2659_s4 + $0x38] sm:$0xff]   ;;  %v453_v15 = vpop.permute.xlu0 %452 }
 0x102   : > { %1856 = vmatprep.subr.bf16.mxu0 %v2014_v29 }
 0x103   : > { %1019 = vxpose.xlu0.b32.cont [9/16] %v964_v47, 128  ;;  %984 = vxpose.xlu1.b32.cont [6/16] %v957_v42, 128  ;;  %v501_v42 = vmul.f32 %v2310_v63, %v2478_v31 }
 0x104   : > { %v665_v7 = vpop.permute.xlu1 %664 }
 0x105   : > { %v725_v52 = vmul.f32 %v2306_v61, %v665_v7  ;;  %v726_v48 = vmul.f32 %v2308_v62, %v665_v7  ;;  %1857 = vmatpush3.bf16.msra.mxu0 %v2014_v29 }
 0x107   : > { %985 = vxpose.xlu1.b32.cont [7/16] %v959_v44, 128  ;;  %v757_v12 = vadd.f32 %v725_v52, %v611_v54  ;;  %v758_v20 = vadd.f32 %v726_v48, %v612_v18  ;;  %v507_v54 = vmul.f32 %v2310_v63, %v453_v15  ;;  %v508_v18 = vmul.f32 %v2312_v0, %v453_v15 }
 0x109   : > { %v807_v19 = vpop.permute.xlu1 %806 }
 0x10a   : > { %v869_v21 = vmul.f32 %v2315_v1, %v807_v19  ;;  %v870_v58 = vmul.f32 %v2325_v13, %v807_v19 }
 0x10b   : > { %986 = vxpose.xlu1.b32.cont [8/16] %v961_v30, 128  ;;  %v504_v30 = vmul.f32 %v2312_v0, %v443_v51 }
 0x10c   : > { %v901_v4 = vadd.f32 %v869_v21, %v755_v56  ;;  %v902_v6 = vadd.f32 %v870_v58, %v756_v3 }
 0x10e   : > { %v933_v26 = vmul.f32 0.01, %v901_v4  ;;  %v934_v43 = vmul.f32 0.01, %v902_v6  ;;  %v569_v14 = vpop.permute.xlu1 %568 }
 0x10f   : > { %987 = vxpose.xlu1.b32.cont [9/16] %v963_v41, 128  ;;  %v613_v36 = vadd.f32 %v569_v14, %v501_v42  ;;  %v614_v47 = vadd.f32 %v569_v14, %v502_v5  ;;  %v731_v5 = vmul.f32 %v2306_v61, %v2301_v57 }
 0x110   : > { %v965_v16 = vmax.f32 %v901_v4, %v933_v26  ;;  %v966_v34 = vmax.f32 %v902_v6, %v934_v43  ;;  %v616_v4 = vadd.f32 %v574_v10, %v504_v30  ;;  %v584_v6 = vpop.permute.xlu0 %583 }
 0x111   : > { %v759_v44 = vadd.f32 %v727_v11, %v613_v36  ;;  %v760_v38 = vadd.f32 %v728_v39, %v614_v47 }
 0x112   : > { %1020 = vxpose.xlu0.b32.cont [10/16] %v966_v34, 128 }
 0x113   : > { %v811_v45 = vpop.permute.xlu1 %810  ;;  %988 = vxpose.xlu1.b32.cont [10/16] %v965_v16, 128 }
 0x114   : > { %v871_v35 = vmul.f32 %v2315_v1, %v811_v45  ;;  %v872_v22 = vmul.f32 %v2325_v13, %v811_v45  ;;  %v589_v17 = vpop.permute.xlu0 %588 }
 0x116   : > { %v903_v24 = vadd.f32 %v871_v35, %v757_v12  ;;  %v904_v2 = vadd.f32 %v872_v22, %v758_v20 }
 0x118   : > { %v935_v27 = vmul.f32 0.01, %v903_v24  ;;  %v936_v33 = vmul.f32 0.01, %v904_v2  ;;  %v448_v28 = vpop.permute.xlu1 %447  ;;  %v827_v22 = vpop.permute.xlu0 %826 }
 0x119   : > { %v505_v12 = vmul.f32 %v2310_v63, %v448_v28  ;;  %v506_v20 = vmul.f32 %v2312_v0, %v448_v28  ;;  %v879_v29 = vmul.f32 %v2315_v1, %v827_v22  ;;  %v880_v42 = vmul.f32 %v2325_v13, %v827_v22 }
 0x11a   : > { %v967_v59 = vmax.f32 %v903_v24, %v935_v27  ;;  %v968_v40 = vmax.f32 %v904_v2, %v936_v33  ;;  %v619_v24 = vadd.f32 %v584_v6, %v507_v54  ;;  %v620_v2 = vadd.f32 %v584_v6, %v508_v18 }
 0x11b   : > { %v732_v28 = vmul.f32 %v2308_v62, %v2301_v57 }
 0x11c   : > { %1021 = vxpose.xlu0.b32.cont [11/16] %v968_v40, 128  ;;  %989 = vxpose.xlu1.b32.cont [11/16] %v967_v59, 128 }
 0x11d   : > { %v673_v32 = vpop.permute.xlu1 %672 }
 0x11e   : > { %v729_v3 = vmul.f32 %v2306_v61, %v673_v32  ;;  %v730_v49 = vmul.f32 %v2308_v62, %v673_v32 }
 0x120   : > { %v761_v8 = vadd.f32 %v729_v3, %v615_v37  ;;  %v762_v9 = vadd.f32 %v730_v49, %v616_v4 }
 0x122   : > { %v815_v7 = vpop.permute.xlu1 %814 }
 0x123   : > { %v873_v46 = vmul.f32 %v2315_v1, %v815_v7  ;;  %v874_v50 = vmul.f32 %v2325_v13, %v815_v7 }
 0x125   : > { %v905_v31 = vadd.f32 %v873_v46, %v759_v44  ;;  %v906_v53 = vadd.f32 %v874_v50, %v760_v38 }
 0x127   : > { %v937_v55 = vmul.f32 0.01, %v905_v31  ;;  %v938_v19 = vmul.f32 0.01, %v906_v53  ;;  %v579_v56 = vpop.permute.xlu1 %578 }
 0x128   : > { %v617_v33 = vadd.f32 %v579_v56, %v505_v12  ;;  %v618_v51 = vadd.f32 %v579_v56, %v506_v20 }
 0x129   : > { %v969_v21 = vmax.f32 %v905_v31, %v937_v55  ;;  %v970_v58 = vmax.f32 %v906_v53, %v938_v19 }
 0x12a   : > { %v763_v36 = vadd.f32 %v731_v5, %v617_v33  ;;  %v764_v47 = vadd.f32 %v732_v28, %v618_v51 }
 0x12b   : > { %1022 = vxpose.xlu0.b32.cont [12/16] %v970_v58, 128  ;;  %990 = vxpose.xlu1.b32.cont [12/16] %v969_v21, 128 }
 0x12c   : > { %v819_v41 = vpop.permute.xlu1 %818 }
 0x12d   : > { %v875_v26 = vmul.f32 %v2315_v1, %v819_v41  ;;  %v876_v43 = vmul.f32 %v2325_v13, %v819_v41 }
 0x12f   : > { %v907_v14 = vadd.f32 %v875_v26, %v761_v8  ;;  %v908_v52 = vadd.f32 %v876_v43, %v762_v9  ;;  %v2015_v43 = vld [vmem:[%s2661_s6] sm:$0xff]  }
 0x130   : > { %1890 = vmatprep.subr.bf16.mxu1 %v2015_v43 }
 0x131   : > { %v939_v48 = vmul.f32 0.01, %v907_v14  ;;  %v940_v16 = vmul.f32 0.01, %v908_v52  ;;  %v458_v34 = vpop.permute.xlu1 %457  ;;  %1891 = vmatpush3.bf16.msra.mxu1 %v2015_v43 }
 0x132   : > { %v509_v46 = vmul.f32 %v2310_v63, %v458_v34  ;;  %v510_v50 = vmul.f32 %v2312_v0, %v458_v34 }
 0x133   : > { %v971_v60 = vmax.f32 %v907_v14, %v939_v48  ;;  %v972_v45 = vmax.f32 %v908_v52, %v940_v16  ;;  %v2018_v14 = vld [vmem:[%s2661_s6 + $0x18] sm:$0xff]   ;;  %v2019_v52 = vld [vmem:[%s2661_s6 + $0x20] sm:$0xff]  }
 0x134   : > { %v621_v3 = vadd.f32 %v589_v17, %v509_v46  ;;  %v622_v49 = vadd.f32 %v589_v17, %v510_v50 }
 0x135   : > { %1023 = vxpose.xlu0.b32.cont [13/16] %v972_v45, 128  ;;  %991 = vxpose.xlu1.b32.cont [13/16] %v971_v60, 128 }
 0x136   : > { %v681_v35 = vpop.permute.xlu1 %680 }
 0x137   : > { %v733_v23 = vmul.f32 %v2306_v61, %v681_v35  ;;  %v734_v27 = vmul.f32 %v2308_v62, %v681_v35 }
 0x139   : > { %v765_v59 = vadd.f32 %v733_v23, %v619_v24  ;;  %v766_v40 = vadd.f32 %v734_v27, %v620_v2 }
 0x13b   : > { %v823_v32 = vpop.permute.xlu1 %822  ;;  %v911_v39 = vadd.f32 %v879_v29, %v765_v59  ;;  %v912_v7 = vadd.f32 %v880_v42, %v766_v40 }
 0x13c   : > { %v877_v10 = vmul.f32 %v2315_v1, %v823_v32  ;;  %v878_v11 = vmul.f32 %v2325_v13, %v823_v32 }
 0x13d   : > { %v943_v25 = vmul.f32 0.01, %v911_v39  ;;  %v944_v57 = vmul.f32 0.01, %v912_v7 }
 0x13e   : > { %v909_v44 = vadd.f32 %v877_v10, %v763_v36  ;;  %v910_v38 = vadd.f32 %v878_v11, %v764_v47 }
 0x13f   : > { %v975_v21 = vmax.f32 %v911_v39, %v943_v25  ;;  %v976_v58 = vmax.f32 %v912_v7, %v944_v57 }
 0x140   : > { %v941_v31 = vmul.f32 0.01, %v909_v44  ;;  %v942_v53 = vmul.f32 0.01, %v910_v38  ;;  %v685_v15 = vpop.permute.xlu1 %684 }
 0x141   : > { %v735_v19 = vmul.f32 %v2306_v61, %v685_v15  ;;  %v736_v56 = vmul.f32 %v2308_v62, %v685_v15 }
 0x142   : > { %v973_v30 = vmax.f32 %v909_v44, %v941_v31  ;;  %v974_v55 = vmax.f32 %v910_v38, %v942_v53 }
 0x143   : > { %v767_v37 = vadd.f32 %v735_v19, %v621_v3  ;;  %v768_v0 = vadd.f32 %v736_v56, %v622_v49 }
 0x144   : > { %1024 = vxpose.xlu0.b32.cont [14/16] %v974_v55, 128  ;;  %992 = vxpose.xlu1.b32.cont [14/16] %v973_v30, 128 }
 0x145   : > { %v831_v63 = vpop.permute.xlu1 %830 }
 0x146   : > { %v881_v4 = vmul.f32 %v2315_v1, %v831_v63  ;;  %v882_v6 = vmul.f32 %v2325_v13, %v831_v63  ;;  %v2016_v1 = vld [vmem:[%s2661_s6 + $0x8] sm:$0xff]   ;;  %v2017_v13 = vld [vmem:[%s2661_s6 + $0x10] sm:$0xff]  }
 0x147   : > { %1892 = vmatprep.subr.bf16.mxu1 %v2016_v1  ;;  %v2020_v63 = vld [vmem:[%s2661_s6 + $0x28] sm:$0xff]  }
 0x148   : > { %v913_v41 = vadd.f32 %v881_v4, %v767_v37  ;;  %v914_v8 = vadd.f32 %v882_v6, %v768_v0  ;;  %1025 = vxpose.xlu0.b32.cont [15/16] %v976_v58, 128  ;;  %993 = vxpose.xlu1.b32.cont [15/16] %v975_v21, 128  ;;  %v2021_v37 = vld [vmem:[%s2661_s6 + $0x30] sm:$0xff]   ;;  %v2022_v0 = vld [vmem:[%s2661_s6 + $0x38] sm:$0xff]   ;;  %v2569_v4 = vld [vmem:[%s2660_s5] ss:$0 sm:$0xff] }
 0x149   : > { %1893 = vmatpush3.bf16.msra.mxu1 %v2016_v1 }
 0x14a   : > { %v945_v61 = vmul.f32 0.01, %v913_v41  ;;  %v946_v9 = vmul.f32 0.01, %v914_v8  ;;  %1894 = vmatprep.subr.bf16.mxu1 %v2017_v13 }
 0x14c   : > { %v977_v62 = vmax.f32 %v913_v41, %v945_v61  ;;  %v978_v26 = vmax.f32 %v914_v8, %v946_v9 }
 0x14d   : > { %1895 = vmatpush3.bf16.msra.mxu1 %v2017_v13 }
 0x14e   : > { %1026 = vxpose.xlu0.b32.end [16/16] %v978_v26, 128  ;;  %994 = vxpose.xlu1.b32.end [16/16] %v977_v62, 128 }
 0x14f   : > { %1896 = vmatprep.subr.bf16.mxu1 %v2018_v14 }
 0x151   : > { %1897 = vmatpush3.bf16.msra.mxu1 %v2018_v14 }
 0x152   : > { %1898 = vmatprep.subr.bf16.mxu1 %v2019_v52 }
 0x155   : > { %1899 = vmatpush3.bf16.msra.mxu1 %v2019_v52 }
 0x156   : > { %1900 = vmatprep.subr.bf16.mxu1 %v2020_v63 }
 0x159   : > { %1901 = vmatpush3.bf16.msra.mxu1 %v2020_v63 }
 0x15a   : > { %1902 = vmatprep.subr.bf16.mxu1 %v2021_v37 }
 0x15d   : > { %1903 = vmatpush3.bf16.msra.mxu1 %v2021_v37 }
 0x15e   : > { %1904 = vmatprep.subr.bf16.mxu1 %v2022_v0 }
 0x161   : > { %1905 = vmatpush3.bf16.msra.mxu1 %v2022_v0 }
 0x192   : > { %v995_v48 = vpop.trf.xlu1  ;;  %v1027_v16 = vpop.trf.xlu0 }
 0x196   : > { %v996_v34 = vpop.trf.xlu1  ;;  %v1028_v17 = vpop.trf.xlu0 }
 0x197   : > { %v1043_v54 = vpack.c.bf16 %v996_v34, %v995_v48  ;;  %v1051_v31 = vpack.c.bf16 %v1028_v17, %v1027_v16 }
 0x199   : > { %1858 = vmatprep.mubr.bf16.mxu0 %v1043_v54 }
 0x19a   : > { %v997_v18 = vpop.trf.xlu1  ;;  %v1029_v60 = vpop.trf.xlu0 }
 0x19e   : > { %v998_v45 = vpop.trf.xlu1  ;;  %v1030_v35 = vpop.trf.xlu0 }
 0x19f   : > { %v1044_v12 = vpack.c.bf16 %v998_v45, %v997_v18  ;;  %v1052_v25 = vpack.c.bf16 %v1030_v35, %v1029_v60 }
 0x1a1   : > { %1859 = vmatmul.mubr.bf16.vlgmr.msra.gmra.mrb[0].mxu0 %v1044_v12 }
 0x1a2   : > { %v999_v20 = vpop.trf.xlu1  ;;  %v1031_v2 = vpop.trf.xlu0 }
 0x1a6   : > { %v1000_v22 = vpop.trf.xlu1  ;;  %v1032_v33 = vpop.trf.xlu0 }
 0x1a7   : > { %v1045_v24 = vpack.c.bf16 %v1000_v22, %v999_v20  ;;  %v1053_v15 = vpack.c.bf16 %v1032_v33, %v1031_v2 }
 0x1a9   : > { %1862 = vmatprep.mubr.bf16.mxu0 %v1045_v24 }
 0x1aa   : > { %v1001_v23 = vpop.trf.xlu1  ;;  %v1033_v40 = vpop.trf.xlu0 }
 0x1ae   : > { %v1002_v27 = vpop.trf.xlu1  ;;  %v1034_v28 = vpop.trf.xlu0 }
 0x1af   : > { %v1046_v51 = vpack.c.bf16 %v1002_v27, %v1001_v23  ;;  %v1054_v30 = vpack.c.bf16 %v1034_v28, %v1033_v40 }
 0x1b1   : > { %1863 = vmatmul.mubr.bf16.gmra.mrb[4].mxu0 %v1046_v51 }
 0x1b2   : > { %v1003_v59 = vpop.trf.xlu1  ;;  %v1035_v47 = vpop.trf.xlu0 }
 0x1b6   : > { %v1004_v29 = vpop.trf.xlu1  ;;  %v1036_v39 = vpop.trf.xlu0 }
 0x1b7   : > { %v1047_v42 = vpack.c.bf16 %v1004_v29, %v1003_v59  ;;  %v1055_v55 = vpack.c.bf16 %v1036_v39, %v1035_v47 }
 0x1b9   : > { %1866 = vmatprep.mubr.bf16.mxu0 %v1047_v42 }
 0x1ba   : > { %v1005_v5 = vpop.trf.xlu1  ;;  %v1037_v38 = vpop.trf.xlu0 }
 0x1be   : > { %v1006_v32 = vpop.trf.xlu1  ;;  %v1038_v53 = vpop.trf.xlu0 }
 0x1bf   : > { %v1048_v36 = vpack.c.bf16 %v1006_v32, %v1005_v5  ;;  %v1056_v3 = vpack.c.bf16 %v1038_v53, %v1037_v38 }
 0x1c1   : > { %1867 = vmatmul.mubr.bf16.gmra.mrb[8].mxu0 %v1048_v36 }
 0x1c2   : > { %v1007_v10 = vpop.trf.xlu1  ;;  %v1039_v57 = vpop.trf.xlu0 }
 0x1c6   : > { %v1008_v11 = vpop.trf.xlu1  ;;  %v1040_v19 = vpop.trf.xlu0 }
 0x1c7   : > { %v1049_v7 = vpack.c.bf16 %v1008_v11, %v1007_v10  ;;  %v1057_v49 = vpack.c.bf16 %v1040_v19, %v1039_v57 }
 0x1c9   : > { %1870 = vmatprep.mubr.bf16.mxu0 %v1049_v7 }
 0x1ca   : > { %v1009_v44 = vpop.trf.xlu1  ;;  %v1041_v56 = vpop.trf.xlu0 }
 0x1ce   : > { %v1010_v46 = vpop.trf.xlu1  ;;  %v1042_v21 = vpop.trf.xlu0 }
 0x1cf   : > { %v1050_v50 = vpack.c.bf16 %v1010_v46, %v1009_v44  ;;  %v1058_v58 = vpack.c.bf16 %v1042_v21, %v1041_v56 }
 0x1d1   : > { %1871 = vmatmul.mubr.bf16.gmra.mrb[12].mxu0 %v1050_v50 }
 0x1d2   : > { %1874 = vmatprep.mubr.bf16.mxu0 %v1051_v31 }
 0x1d9   : > { %1875 = vmatmul.mubr.bf16.gmra.mrb[16].mxu0 %v1052_v25 }
 0x1da   : > { %1878 = vmatprep.mubr.bf16.mxu0 %v1053_v15 }
 0x1e1   : > { %1879 = vmatmul.mubr.bf16.gmra.mrb[20].mxu0 %v1054_v30 }
 0x1e2   : > { %1882 = vmatprep.mubr.bf16.mxu0 %v1055_v55 }
 0x1e9   : > { %1883 = vmatmul.mubr.bf16.gmra.mrb[24].mxu0 %v1056_v3 }
 0x1ea   : > { %1886 = vmatprep.mubr.bf16.mxu0 %v1057_v49 }
 0x1f1   : > { %1887 = vmatmul.mubr.bf16.gmra.mrb[28].mxu0 %v1058_v58 }
 0x274   : > { %v1860_v6 = vpop.f32.mrb[0].mxu0 }
 0x275   : > { %v1173_v41 = vadd.f32 %v1860_v6, %v2569_v4  ;;  %v1164_v8 = vpop.f32.mrb[1].mxu0 }
 0x276   : > { %v1165_v61 = vadd.f32 %v2569_v4, %v1164_v8  ;;  %v1861_v9 = vpop.f32.mrb[2].mxu0 }
 0x277   : > { %v1293_v62 = vmul.f32 0.01, %v1173_v41  ;;  %v1176_v26 = vadd.f32 %v1861_v9, %v2569_v4  ;;  %v1167_v43 = vpop.f32.mrb[3].mxu0 }
 0x278   : > { %v1291_v1 = vmul.f32 0.01, %v1165_v61  ;;  %v1168_v13 = vadd.f32 %v2569_v4, %v1167_v43 }
 0x279   : > { %v1294_v14 = vmul.f32 0.01, %v1176_v26  ;;  %v1325_v48 = vmax.f32 %v1173_v41, %v1293_v62 }
 0x27a   : > { %v1292_v52 = vmul.f32 0.01, %v1168_v13  ;;  %v1323_v34 = vmax.f32 %v1165_v61, %v1291_v1 }
 0x27b   : > { %v1326_v16 = vmax.f32 %v1176_v26, %v1294_v14 }
 0x27c   : > { %v1324_v17 = vmax.f32 %v1168_v13, %v1292_v52 }
 0x27d   : > { %v1356_v54 = vpack.c.bf16 %v1326_v16, %v1325_v48 }
 0x27e   : > { %v1355_v18 = vpack.c.bf16 %v1324_v17, %v1323_v34 }
 0x280   : > { %1906 = vmatprep.mubr.bf16.mxu1 %v1355_v18 }
 0x281   : > { %1907 = vmatmul.mubr.bf16.vlgmr.msra.gmra.mrb[0].mxu1 %v1356_v54 }
 0x284   : > { %v1864_v60 = vpop.f32.mrb[4].mxu0 }
 0x285   : > { %v1189_v45 = vadd.f32 %v1864_v60, %v2569_v4  ;;  %v1180_v12 = vpop.f32.mrb[5].mxu0 }
 0x286   : > { %v1181_v20 = vadd.f32 %v2569_v4, %v1180_v12  ;;  %v1865_v35 = vpop.f32.mrb[6].mxu0 }
 0x287   : > { %v1297_v22 = vmul.f32 0.01, %v1189_v45  ;;  %v1192_v24 = vadd.f32 %v1865_v35, %v2569_v4  ;;  %v1183_v2 = vpop.f32.mrb[7].mxu0 }
 0x288   : > { %v1295_v23 = vmul.f32 0.01, %v1181_v20  ;;  %v1184_v27 = vadd.f32 %v2569_v4, %v1183_v2 }
 0x289   : > { %v1298_v33 = vmul.f32 0.01, %v1192_v24  ;;  %v1329_v59 = vmax.f32 %v1189_v45, %v1297_v22 }
 0x28a   : > { %v1296_v51 = vmul.f32 0.01, %v1184_v27  ;;  %v1327_v29 = vmax.f32 %v1181_v20, %v1295_v23 }
 0x28b   : > { %v1330_v40 = vmax.f32 %v1192_v24, %v1298_v33 }
 0x28c   : > { %v1328_v42 = vmax.f32 %v1184_v27, %v1296_v51 }
 0x28d   : > { %v1358_v5 = vpack.c.bf16 %v1330_v40, %v1329_v59 }
 0x28e   : > { %v1357_v28 = vpack.c.bf16 %v1328_v42, %v1327_v29 }
 0x290   : > { %1910 = vmatprep.mubr.bf16.mxu1 %v1357_v28 }
 0x291   : > { %1911 = vmatmul.mubr.bf16.gmra.mrb[4].mxu1 %v1358_v5 }
 0x294   : > { %v1868_v32 = vpop.f32.mrb[8].mxu0 }
 0x295   : > { %v1205_v36 = vadd.f32 %v1868_v32, %v2569_v4  ;;  %v1196_v47 = vpop.f32.mrb[9].mxu0 }
 0x296   : > { %v1197_v10 = vadd.f32 %v2569_v4, %v1196_v47  ;;  %v1869_v11 = vpop.f32.mrb[10].mxu0 }
 0x297   : > { %v1301_v39 = vmul.f32 0.01, %v1205_v36  ;;  %v1208_v7 = vadd.f32 %v1869_v11, %v2569_v4  ;;  %v1199_v44 = vpop.f32.mrb[11].mxu0 }
 0x298   : > { %v1299_v38 = vmul.f32 0.01, %v1197_v10  ;;  %v1200_v46 = vadd.f32 %v2569_v4, %v1199_v44 }
 0x299   : > { %v1302_v50 = vmul.f32 0.01, %v1208_v7  ;;  %v1333_v53 = vmax.f32 %v1205_v36, %v1301_v39 }
 0x29a   : > { %v1300_v31 = vmul.f32 0.01, %v1200_v46  ;;  %v1331_v25 = vmax.f32 %v1197_v10, %v1299_v38 }
 0x29b   : > { %v1334_v15 = vmax.f32 %v1208_v7, %v1302_v50 }
 0x29c   : > { %v1332_v57 = vmax.f32 %v1200_v46, %v1300_v31 }
 0x29d   : > { %v1360_v30 = vpack.c.bf16 %v1334_v15, %v1333_v53 }
 0x29e   : > { %v1359_v55 = vpack.c.bf16 %v1332_v57, %v1331_v25 }
 0x2a0   : > { %1914 = vmatprep.mubr.bf16.mxu1 %v1359_v55 }
 0x2a1   : > { %1915 = vmatmul.mubr.bf16.gmra.mrb[8].mxu1 %v1360_v30 }
 0x2a4   : > { %v1872_v19 = vpop.f32.mrb[12].mxu0 }
 0x2a5   : > { %v1221_v56 = vadd.f32 %v1872_v19, %v2569_v4  ;;  %v1212_v3 = vpop.f32.mrb[13].mxu0 }
 0x2a6   : > { %v1213_v49 = vadd.f32 %v2569_v4, %v1212_v3  ;;  %v1873_v21 = vpop.f32.mrb[14].mxu0 }
 0x2a7   : > { %v1305_v58 = vmul.f32 0.01, %v1221_v56  ;;  %v1224_v63 = vadd.f32 %v1873_v21, %v2569_v4  ;;  %v1215_v37 = vpop.f32.mrb[15].mxu0 }
 0x2a8   : > { %v1303_v0 = vmul.f32 0.01, %v1213_v49  ;;  %v1216_v6 = vadd.f32 %v2569_v4, %v1215_v37 }
 0x2a9   : > { %v1306_v41 = vmul.f32 0.01, %v1224_v63  ;;  %v1337_v61 = vmax.f32 %v1221_v56, %v1305_v58 }
 0x2aa   : > { %v1304_v8 = vmul.f32 0.01, %v1216_v6  ;;  %v1335_v62 = vmax.f32 %v1213_v49, %v1303_v0 }
 0x2ab   : > { %v1338_v9 = vmax.f32 %v1224_v63, %v1306_v41 }
 0x2ac   : > { %v1336_v26 = vmax.f32 %v1216_v6, %v1304_v8  ;;  %v1876_v43 = vpop.f32.mrb[16].mxu0 }
 0x2ad   : > { %v1237_v1 = vadd.f32 %v1876_v43, %v2569_v4  ;;  %v1228_v13 = vpop.f32.mrb[17].mxu0  ;;  %v1362_v14 = vpack.c.bf16 %v1338_v9, %v1337_v61 }
 0x2ae   : > { %v1229_v52 = vadd.f32 %v2569_v4, %v1228_v13  ;;  %v1877_v48 = vpop.f32.mrb[18].mxu0  ;;  %v1361_v16 = vpack.c.bf16 %v1336_v26, %v1335_v62 }
 0x2af   : > { %v1309_v34 = vmul.f32 0.01, %v1237_v1  ;;  %v1240_v17 = vadd.f32 %v1877_v48, %v2569_v4  ;;  %v1231_v54 = vpop.f32.mrb[19].mxu0 }
 0x2b0   : > { %v1307_v18 = vmul.f32 0.01, %v1229_v52  ;;  %v1232_v60 = vadd.f32 %v2569_v4, %v1231_v54  ;;  %1918 = vmatprep.mubr.bf16.mxu1 %v1361_v16 }
 0x2b1   : > { %v1310_v45 = vmul.f32 0.01, %v1240_v17  ;;  %1919 = vmatmul.mubr.bf16.gmra.mrb[12].mxu1 %v1362_v14  ;;  %v1341_v20 = vmax.f32 %v1237_v1, %v1309_v34 }
 0x2b2   : > { %v1308_v12 = vmul.f32 0.01, %v1232_v60  ;;  %v1339_v22 = vmax.f32 %v1229_v52, %v1307_v18 }
 0x2b3   : > { %v1342_v35 = vmax.f32 %v1240_v17, %v1310_v45 }
 0x2b4   : > { %v1340_v24 = vmax.f32 %v1232_v60, %v1308_v12  ;;  %v1880_v2 = vpop.f32.mrb[20].mxu0  ;;  %v2606_v60 = vld [vmem:[%s2662_s7] ss:$0 sm:$0xff] }
 0x2b5   : > { %v1253_v23 = vadd.f32 %v1880_v2, %v2569_v4  ;;  %v1244_v27 = vpop.f32.mrb[21].mxu0  ;;  %v1364_v33 = vpack.c.bf16 %v1342_v35, %v1341_v20 }
 0x2b6   : > { %v1245_v51 = vadd.f32 %v2569_v4, %v1244_v27  ;;  %v1881_v59 = vpop.f32.mrb[22].mxu0  ;;  %v1363_v40 = vpack.c.bf16 %v1340_v24, %v1339_v22 }
 0x2b7   : > { %v1313_v29 = vmul.f32 0.01, %v1253_v23  ;;  %v1256_v42 = vadd.f32 %v1881_v59, %v2569_v4  ;;  %v1247_v5 = vpop.f32.mrb[23].mxu0 }
 0x2b8   : > { %v1311_v28 = vmul.f32 0.01, %v1245_v51  ;;  %v1248_v32 = vadd.f32 %v2569_v4, %v1247_v5  ;;  %1922 = vmatprep.mubr.bf16.mxu1 %v1363_v40 }
 0x2b9   : > { %v1345_v36 = vmax.f32 %v1253_v23, %v1313_v29  ;;  %v1314_v47 = vmul.f32 0.01, %v1256_v42  ;;  %1923 = vmatmul.mubr.bf16.gmra.mrb[16].mxu1 %v1364_v33 }
 0x2ba   : > { %v1343_v10 = vmax.f32 %v1245_v51, %v1311_v28  ;;  %v1312_v11 = vmul.f32 0.01, %v1248_v32 }
 0x2bb   : > { %v1346_v39 = vmax.f32 %v1256_v42, %v1314_v47 }
 0x2bc   : > { %v1344_v7 = vmax.f32 %v1248_v32, %v1312_v11  ;;  %v1884_v44 = vpop.f32.mrb[24].mxu0 }
 0x2bd   : > { %v1269_v38 = vadd.f32 %v1884_v44, %v2569_v4  ;;  %v1260_v46 = vpop.f32.mrb[25].mxu0  ;;  %v1366_v50 = vpack.c.bf16 %v1346_v39, %v1345_v36 }
 0x2be   : > { %v1261_v31 = vadd.f32 %v2569_v4, %v1260_v46  ;;  %v1365_v53 = vpack.c.bf16 %v1344_v7, %v1343_v10  ;;  %v1885_v15 = vpop.f32.mrb[26].mxu0 }
 0x2bf   : > { %v1317_v25 = vmul.f32 0.01, %v1269_v38  ;;  %v1272_v57 = vadd.f32 %v1885_v15, %v2569_v4  ;;  %v1263_v30 = vpop.f32.mrb[27].mxu0 }
 0x2c0   : > { %v1315_v55 = vmul.f32 0.01, %v1261_v31  ;;  %1926 = vmatprep.mubr.bf16.mxu1 %v1365_v53  ;;  %v1264_v19 = vadd.f32 %v2569_v4, %v1263_v30 }
 0x2c1   : > { %v1349_v56 = vmax.f32 %v1269_v38, %v1317_v25  ;;  %v1318_v3 = vmul.f32 0.01, %v1272_v57  ;;  %1927 = vmatmul.mubr.bf16.gmra.mrb[20].mxu1 %v1366_v50 }
 0x2c2   : > { %v1347_v49 = vmax.f32 %v1261_v31, %v1315_v55  ;;  %v1316_v21 = vmul.f32 0.01, %v1264_v19 }
 0x2c3   : > { %v1350_v58 = vmax.f32 %v1272_v57, %v1318_v3 }
 0x2c4   : > { %v1348_v63 = vmax.f32 %v1264_v19, %v1316_v21  ;;  %v1888_v37 = vpop.f32.mrb[28].mxu0 }
 0x2c5   : > { %v1368_v0 = vpack.c.bf16 %v1350_v58, %v1349_v56  ;;  %v1285_v6 = vadd.f32 %v1888_v37, %v2569_v4  ;;  %v1276_v41 = vpop.f32.mrb[29].mxu0 }
 0x2c6   : > { %v1367_v8 = vpack.c.bf16 %v1348_v63, %v1347_v49  ;;  %v1277_v61 = vadd.f32 %v2569_v4, %v1276_v41  ;;  %v1889_v9 = vpop.f32.mrb[30].mxu0 }
 0x2c7   : > { %v1321_v62 = vmul.f32 0.01, %v1285_v6  ;;  %v1288_v26 = vadd.f32 %v1889_v9, %v2569_v4  ;;  %v1279_v43 = vpop.f32.mrb[31].mxu0 }
 0x2c8   : > { %1930 = vmatprep.mubr.bf16.mxu1 %v1367_v8  ;;  %v1319_v1 = vmul.f32 0.01, %v1277_v61  ;;  %v1280_v13 = vadd.f32 %v2569_v4, %v1279_v43 }
 0x2c9   : > { %1931 = vmatmul.mubr.bf16.gmra.mrb[24].mxu1 %v1368_v0  ;;  %v1353_v14 = vmax.f32 %v1285_v6, %v1321_v62  ;;  %v1322_v52 = vmul.f32 0.01, %v1288_v26 }
 0x2ca   : > { %v1351_v48 = vmax.f32 %v1277_v61, %v1319_v1  ;;  %v1320_v16 = vmul.f32 0.01, %v1280_v13 }
 0x2cb   : > { %v1354_v34 = vmax.f32 %v1288_v26, %v1322_v52 }
 0x2cc   : > { %v1352_v17 = vmax.f32 %v1280_v13, %v1320_v16 }
 0x2cd   : > { %v1370_v54 = vpack.c.bf16 %v1354_v34, %v1353_v14 }
 0x2ce   : > { %v1369_v18 = vpack.c.bf16 %v1352_v17, %v1351_v48 }
 0x2d0   : > { %1934 = vmatprep.mubr.bf16.mxu1 %v1369_v18 }
 0x2d1   : > { %1935 = vmatmul.mubr.bf16.gmra.mrb[28].mxu1 %v1370_v54 }
 0x354   : > { %v1908_v45 = vpop.f32.mrb[0].mxu1 }
 0x355   : > { %v1476_v12 = vpop.f32.mrb[1].mxu1  ;;  %v1485_v24 = vadd.f32 %v1908_v45, %v2606_v60 }
 0x356   : > { %v1477_v4 = vadd.f32 %v2606_v60, %v1476_v12  ;;  %v1909_v20 = vpop.f32.mrb[2].mxu1  ;;  %v1668_v12 = vstv %s1667_s23 }
 0x357   : > { %v1479_v35 = vpop.f32.mrb[3].mxu1  ;;  %v1488_v2 = vadd.f32 %v1909_v20, %v2606_v60  ;;  %v2023_v20 = vld [vmem:[%s2291_s16] sm:$0x77] }
 0x358   : > { %1603 = vxpose.xlu0.b32.start [1/16] (narrow) %v1477_v4, 8  ;;  %v1480_v22 = vadd.f32 %v2606_v60, %v1479_v35  ;;  %v1669_v35 = vmul.f32 %v2023_v20, %v1668_v12 }
 0x35c   : > { %1604 = vxpose.xlu0.b32.cont [2/16] (narrow) %v1480_v22, 8 }
 0x360   : > { %1605 = vxpose.xlu0.b32.cont [3/16] (narrow) %v1485_v24, 8 }
 0x364   : > { %1606 = vxpose.xlu0.b32.cont [4/16] (narrow) %v1488_v2, 8  ;;  %v1912_v23 = vpop.f32.mrb[4].mxu1 }
 0x365   : > { %v1492_v27 = vpop.f32.mrb[5].mxu1  ;;  %v1501_v29 = vadd.f32 %v1912_v23, %v2606_v60 }
 0x366   : > { %v1493_v33 = vadd.f32 %v2606_v60, %v1492_v27  ;;  %v1913_v51 = vpop.f32.mrb[6].mxu1 }
 0x367   : > { %v1495_v59 = vpop.f32.mrb[7].mxu1  ;;  %v1504_v42 = vadd.f32 %v1913_v51, %v2606_v60 }
 0x368   : > { %1607 = vxpose.xlu0.b32.cont [5/16] (narrow) %v1493_v33, 8  ;;  %v1496_v40 = vadd.f32 %v2606_v60, %v1495_v59 }
 0x36c   : > { %1608 = vxpose.xlu0.b32.cont [6/16] (narrow) %v1496_v40, 8 }
 0x370   : > { %1609 = vxpose.xlu0.b32.cont [7/16] (narrow) %v1501_v29, 8 }
 0x374   : > { %1610 = vxpose.xlu0.b32.cont [8/16] (narrow) %v1504_v42, 8  ;;  %v1916_v5 = vpop.f32.mrb[8].mxu1 }
 0x375   : > { %v1508_v28 = vpop.f32.mrb[9].mxu1  ;;  %v1517_v11 = vadd.f32 %v1916_v5, %v2606_v60 }
 0x376   : > { %v1509_v32 = vadd.f32 %v2606_v60, %v1508_v28  ;;  %v1917_v36 = vpop.f32.mrb[10].mxu1 }
 0x377   : > { %v1511_v47 = vpop.f32.mrb[11].mxu1  ;;  %v1520_v39 = vadd.f32 %v1917_v36, %v2606_v60 }
 0x378   : > { %1611 = vxpose.xlu0.b32.cont [9/16] (narrow) %v1509_v32, 8  ;;  %v1512_v10 = vadd.f32 %v2606_v60, %v1511_v47 }
 0x37c   : > { %1612 = vxpose.xlu0.b32.cont [10/16] (narrow) %v1512_v10, 8 }
 0x380   : > { %1613 = vxpose.xlu0.b32.cont [11/16] (narrow) %v1517_v11, 8 }
 0x384   : > { %1614 = vxpose.xlu0.b32.cont [12/16] (narrow) %v1520_v39, 8  ;;  %v1920_v7 = vpop.f32.mrb[12].mxu1 }
 0x385   : > { %v1524_v44 = vpop.f32.mrb[13].mxu1  ;;  %v1533_v25 = vadd.f32 %v1920_v7, %v2606_v60 }
 0x386   : > { %v1525_v38 = vadd.f32 %v2606_v60, %v1524_v44  ;;  %v1921_v46 = vpop.f32.mrb[14].mxu1 }
 0x387   : > { %v1527_v50 = vpop.f32.mrb[15].mxu1  ;;  %v1536_v19 = vadd.f32 %v1921_v46, %v2606_v60 }
 0x388   : > { %1615 = vxpose.xlu0.b32.cont [13/16] (narrow) %v1525_v38, 8  ;;  %v1528_v31 = vadd.f32 %v2606_v60, %v1527_v50 }
 0x38c   : > { %v1924_v53 = vpop.f32.mrb[16].mxu1  ;;  %1616 = vxpose.xlu0.b32.cont [14/16] (narrow) %v1528_v31, 8 }
 0x38d   : > { %v1540_v15 = vpop.f32.mrb[17].mxu1  ;;  %v1549_v21 = vadd.f32 %v1924_v53, %v2606_v60 }
 0x38e   : > { %v1541_v57 = vadd.f32 %v2606_v60, %v1540_v15  ;;  %v1925_v30 = vpop.f32.mrb[18].mxu1 }
 0x38f   : > { %v1543_v55 = vpop.f32.mrb[19].mxu1  ;;  %v1552_v37 = vadd.f32 %v1925_v30, %v2606_v60 }
 0x390   : > { %1635 = vxpose.xlu1.b32.start [1/16] (narrow) %v1541_v57, 8  ;;  %1617 = vxpose.xlu0.b32.cont [15/16] (narrow) %v1533_v25, 8  ;;  %v1544_v56 = vadd.f32 %v2606_v60, %v1543_v55 }
 0x394   : > { %v1928_v3 = vpop.f32.mrb[20].mxu1  ;;  %1636 = vxpose.xlu1.b32.cont [2/16] (narrow) %v1544_v56, 8  ;;  %1618 = vxpose.xlu0.b32.end [16/16] (narrow) %v1536_v19, 8 }
 0x395   : > { %v1556_v49 = vpop.f32.mrb[21].mxu1  ;;  %v1565_v43 = vadd.f32 %v1928_v3, %v2606_v60 }
 0x396   : > { %v1929_v58 = vpop.f32.mrb[22].mxu1  ;;  %v1557_v41 = vadd.f32 %v2606_v60, %v1556_v49 }
 0x397   : > { %v1559_v63 = vpop.f32.mrb[23].mxu1  ;;  %v1568_v14 = vadd.f32 %v1929_v58, %v2606_v60 }
 0x398   : > { %1637 = vxpose.xlu1.b32.cont [3/16] (narrow) %v1549_v21, 8  ;;  %v1560_v9 = vadd.f32 %v2606_v60, %v1559_v63 }
 0x39c   : > { %1638 = vxpose.xlu1.b32.cont [4/16] (narrow) %v1552_v37, 8  ;;  %v1932_v0 = vpop.f32.mrb[24].mxu1 }
 0x39d   : > { %v1572_v6 = vpop.f32.mrb[25].mxu1  ;;  %v1581_v16 = vadd.f32 %v1932_v0, %v2606_v60 }
 0x39e   : > { %v1933_v8 = vpop.f32.mrb[26].mxu1  ;;  %v1573_v52 = vadd.f32 %v2606_v60, %v1572_v6 }
 0x39f   : > { %v1575_v61 = vpop.f32.mrb[27].mxu1  ;;  %v1584_v34 = vadd.f32 %v1933_v8, %v2606_v60 }
 0x3a0   : > { %1639 = vxpose.xlu1.b32.cont [5/16] (narrow) %v1557_v41, 8  ;;  %v1576_v48 = vadd.f32 %v2606_v60, %v1575_v61 }
 0x3a4   : > { %1640 = vxpose.xlu1.b32.cont [6/16] (narrow) %v1560_v9, 8  ;;  %v1936_v62 = vpop.f32.mrb[28].mxu1 }
 0x3a5   : > { %v1588_v26 = vpop.f32.mrb[29].mxu1  ;;  %v1597_v18 = vadd.f32 %v1936_v62, %v2606_v60 }
 0x3a6   : > { %v1937_v1 = vpop.f32.mrb[30].mxu1  ;;  %v1589_v17 = vadd.f32 %v2606_v60, %v1588_v26 }
 0x3a7   : > { %v1591_v13 = vpop.f32.mrb[31].mxu1  ;;  %v1600_v45 = vadd.f32 %v1937_v1, %v2606_v60 }
 0x3a8   : > { %1641 = vxpose.xlu1.b32.cont [7/16] (narrow) %v1565_v43, 8  ;;  %v1592_v54 = vadd.f32 %v2606_v60, %v1591_v13 }
 0x3ac   : > { %1642 = vxpose.xlu1.b32.cont [8/16] (narrow) %v1568_v14, 8 }
 0x3b0   : > { %1643 = vxpose.xlu1.b32.cont [9/16] (narrow) %v1573_v52, 8 }
 0x3b4   : > { %1644 = vxpose.xlu1.b32.cont [10/16] (narrow) %v1576_v48, 8 }
 0x3b8   : > { %1645 = vxpose.xlu1.b32.cont [11/16] (narrow) %v1581_v16, 8 }
 0x3bc   : > { %1646 = vxpose.xlu1.b32.cont [12/16] (narrow) %v1584_v34, 8 }
 0x3c0   : > { %1647 = vxpose.xlu1.b32.cont [13/16] (narrow) %v1589_v17, 8 }
 0x3c4   : > { %1648 = vxpose.xlu1.b32.cont [14/16] (narrow) %v1592_v54, 8 }
 0x3c8   : > { %1649 = vxpose.xlu1.b32.cont [15/16] (narrow) %v1597_v18, 8 }
 0x3cc   : > { %1650 = vxpose.xlu1.b32.end [16/16] (narrow) %v1600_v45, 8 }
 0x3d8   : > { %v1619_v4 = vpop.trf.xlu0 }
 0x410   : > { %v1651_v22 = vpop.trf.xlu1 }
 0x411   : > { %v1672_v24 = vcombine.low %v1619_v4, %v1651_v22 }
 0x413   : > { %v1674_v2 = vadd.f32 %v1672_v24, %v1669_v35 }
 0x415   : > { %1675 = vst [vmem:[%s344_s26] sm:$0x77] %v1674_v2 }
 0x416 PF: > { %s19_s9 = sadd.s32 1, %s2046_s9   ;;  %s2664_s29 = smov %s2042_s30 }
 0x417   : > { %p16_p5 = scmp.ge.s32.totalorder %s19_s9, 4   ;;  %s2665_s30 = smov %s2667_s0 }
 0x419   :  { %18 = sbr.rel (!%p16_p5) target bundleno = 2 (0x2), region = 82 }

</bundles_post_ra>
